<compile_context>
chip_gen: v7x
topology: tpu7x:2x2x1
jax: 0.10.0
libtpu: 0.0.40
codegen_flags: <defaults>
</compile_context>

<pallas_src>
import functools

import jax
import jax.numpy as jnp
from jax.experimental import pallas as pl
from jax.experimental.pallas import tpu as pltpu

EPS = 1e-5


def _round_up(x, m):
    return (x + m - 1) // m * m


# --------------------------------------------------------------------------
# Kernel
# --------------------------------------------------------------------------
def _encoder_kernel(n_resblk1, n_resblk2, b_real, x_ref, w_ref, vec_ref, o_ref):
    """x_ref [Bp, P], w_ref [Nw, P, P], vec_ref [Nv, P], o_ref [Bp, P]."""
    Bp = x_ref.shape[0]

    n_lin = 2 + 2 * n_resblk1 + n_resblk2 + 1     # number of bias rows
    n_bn = 2 + 2 * n_resblk1 + n_resblk2          # number of gamma/beta rows

    inv_n = jnp.float32(1.0 / b_real)
    padded_batch = (Bp != b_real)
    use_mxu_stats = Bp >= 64                      # static decision

    # Hoisted (built once, not per-BN) batch masks for the statistics.
    row_mask = None
    stat_lhs = None
    if use_mxu_stats:
        if padded_batch:
            cols = jax.lax.broadcasted_iota(jnp.int32, (1, Bp), 1)
            stat_lhs = (cols < b_real).astype(jnp.float32)
        else:
            stat_lhs = jnp.ones((1, Bp), jnp.float32)
    elif padded_batch:
        rows = jax.lax.broadcasted_iota(jnp.int32, (Bp, 1), 0)
        row_mask = (rows < b_real).astype(jnp.float32)

    # ---- small static-index helpers into the packed parameter stacks ----
    def bias(i):
        return vec_ref[i:i + 1, :]

    def gamma(i):
        return vec_ref[n_lin + i:n_lin + i + 1, :]

    def beta(i):
        return vec_ref[n_lin + n_bn + i:n_lin + n_bn + i + 1, :]

    def lin(h, wi, bi):
        return jnp.dot(h, w_ref[wi], preferred_element_type=jnp.float32) + bias(bi)

    def lin2(h1, wi1, h2, wi2, bi):
        # split matmul replacing concat([h1, h2]) @ W
        acc = jnp.dot(h1, w_ref[wi1], preferred_element_type=jnp.float32)
        acc = acc + jnp.dot(h2, w_ref[wi2], preferred_element_type=jnp.float32)
        return acc + bias(bi)

    def bn(h, gi):
        # single pass: sum + sum-of-squares (masked against padded rows)
        if use_mxu_stats:
            s1 = jnp.dot(stat_lhs, h, preferred_element_type=jnp.float32)
            s2 = jnp.dot(stat_lhs, h * h, preferred_element_type=jnp.float32)
        else:
            hm = h if row_mask is None else h * row_mask
            s1 = jnp.sum(hm, axis=0, keepdims=True)
            s2 = jnp.sum(hm * h, axis=0, keepdims=True)
        mean = s1 * inv_n
        var = s2 * inv_n - mean * mean
        scale = gamma(gi) * jax.lax.rsqrt(var + EPS)   # fused gamma*rsqrt
        return (h - mean) * scale + beta(gi)

    # ---------------------------- forward ----------------------------
    inp = x_ref[...].astype(jnp.float32)

    # fc_in: (Linear -> ReLU -> BN) x 2
    h = bn(jnp.maximum(lin(inp, 0, 0), 0.0), 0)
    h = bn(jnp.maximum(lin(h, 1, 1), 0.0), 1)
    wi, bi, gi = 2, 2, 2

    # resblk1: [h, inp] -> Linear -> ReLU -> BN -> Linear -> ReLU -> BN
    for _ in range(n_resblk1):
        h = bn(jnp.maximum(lin2(h, wi, inp, wi + 1, bi), 0.0), gi)
        wi += 2; bi += 1; gi += 1
        h = bn(jnp.maximum(lin(h, wi, bi), 0.0), gi)
        wi += 1; bi += 1; gi += 1

    # resblk2: [h, x_prev] -> Linear -> ReLU -> BN
    x_prev = h
    for _ in range(n_resblk2):
        h = bn(jnp.maximum(lin2(h, wi, x_prev, wi + 1, bi), 0.0), gi)
        wi += 2; bi += 1; gi += 1

    # fc_out: Linear
    out = jnp.dot(h, w_ref[wi], preferred_element_type=jnp.float32) + bias(bi)
    o_ref[...] = out.astype(o_ref.dtype)


# --------------------------------------------------------------------------
# Parameter init (matches the torch module's shapes / default init)
# --------------------------------------------------------------------------
def init_params(key, cfg):
    """Linear: uniform(-1/sqrt(fan_in), 1/sqrt(fan_in)), stored as [in, out].
    BatchNorm1d: gamma=1, beta=0."""
    d_in, d_out, d_h = cfg["d_in"], cfg["d_out"], cfg["d_hidden"]
    d_h2 = d_h // 2

    def linear(k, din, dout):
        k1, k2 = jax.random.split(k)
        bound = 1.0 / (din ** 0.5)
        W = jax.random.uniform(k1, (din, dout), jnp.float32, -bound, bound)
        b = jax.random.uniform(k2, (1, dout), jnp.float32, -bound, bound)
        return W, b

    def bn(dim):
        return jnp.ones((1, dim), jnp.float32), jnp.zeros((1, dim), jnp.float32)

    keys = iter(jax.random.split(key, 64))

    units = []  # (W, b, gamma, beta) per Linear+ReLU+BN unit, in forward order
    units.append(linear(next(keys), d_in, d_h2) + bn(d_h2))
    units.append(linear(next(keys), d_h2, d_h) + bn(d_h))
    for _ in range(cfg["n_resblk1"]):
        units.append(linear(next(keys), d_h + d_in, d_h) + bn(d_h))
        units.append(linear(next(keys), d_h, d_h) + bn(d_h))
    for _ in range(cfg["n_resblk2"]):
        units.append(linear(next(keys), 2 * d_h, d_h) + bn(d_h))
    fc_out = linear(next(keys), d_h, d_out)
    return units, fc_out


# --------------------------------------------------------------------------
# Wrapper: pack / pad parameters and call the kernel
# --------------------------------------------------------------------------
def encoder_resnet_forward(x, units, fc_out, cfg):
    d_in, d_out, d_h = cfg["d_in"], cfg["d_out"], cfg["d_hidden"]
    n1, n2 = cfg["n_resblk1"], cfg["n_resblk2"]
    B = x.shape[0]

    P = _round_up(max(d_in, d_out, d_h), 128)   # common lane-aligned feature width
    Bp = _round_up(B, 8)                        # sublane-aligned batch

    def pad_w(w):
        w = w.astype(jnp.float32)
        return jnp.pad(w, ((0, P - w.shape[0]), (0, P - w.shape[1])))

    def pad_row(v):
        v = v.astype(jnp.float32).reshape(1, -1)
        return jnp.pad(v, ((0, 0), (0, P - v.shape[-1])))

    w_list, b_rows, g_rows, be_rows = [], [], [], []
    it = iter(units)

    # fc_in (2 plain units)
    for _ in range(2):
        W, b, g, be = next(it)
        w_list.append(pad_w(W))
        b_rows.append(pad_row(b)); g_rows.append(pad_row(g)); be_rows.append(pad_row(be))
    # resblk1: split the concat-weight [d_h + d_in, d_h] into two [*, d_h] blocks
    for _ in range(n1):
        W, b, g, be = next(it)
        w_list.append(pad_w(W[:d_h])); w_list.append(pad_w(W[d_h:]))
        b_rows.append(pad_row(b)); g_rows.append(pad_row(g)); be_rows.append(pad_row(be))
        W, b, g, be = next(it)
        w_list.append(pad_w(W))
        b_rows.append(pad_row(b)); g_rows.append(pad_row(g)); be_rows.append(pad_row(be))
    # resblk2: split [2*d_h, d_h]
    for _ in range(n2):
        W, b, g, be = next(it)
        w_list.append(pad_w(W[:d_h])); w_list.append(pad_w(W[d_h:]))
        b_rows.append(pad_row(b)); g_rows.append(pad_row(g)); be_rows.append(pad_row(be))
    # fc_out
    Wo, bo = fc_out
    w_list.append(pad_w(Wo))
    b_rows.append(pad_row(bo))

    w_stack = jnp.stack(w_list)                                   # [Nw, P, P]
    vec_stack = jnp.concatenate(b_rows + g_rows + be_rows, 0)     # [Nv, P]
    x_pad = jnp.pad(x.astype(jnp.float32), ((0, Bp - B), (0, P - d_in)))

    # VMEM budget: everything resident (tiny at these sizes); generous headroom.
    total_bytes = 4 * (w_stack.size + vec_stack.size + x_pad.size + Bp * P)
    vmem_limit = int(min(64 << 20, max(8 * total_bytes, 16 << 20)))

    kernel = functools.partial(_encoder_kernel, n1, n2, B)
    vmem = pl.BlockSpec(memory_space=pltpu.MemorySpace.VMEM)
    out = pl.pallas_call(
        kernel,
        out_shape=jax.ShapeDtypeStruct((Bp, P), jnp.float32),
        in_specs=[vmem, vmem, vmem],
        out_specs=vmem,
        compiler_params=pltpu.CompilerParams(vmem_limit_bytes=vmem_limit),
    )(x_pad, w_stack, vec_stack)

    return out[:B, :d_out]


# --------------------------------------------------------------------------
# Pure-JAX reference (mirrors torch training-mode semantics exactly)
# --------------------------------------------------------------------------
def _bn_train_ref(h, gamma, beta):
    mean = jnp.mean(h, axis=0, keepdims=True)
    var = jnp.mean(jnp.square(h - mean), axis=0, keepdims=True)
    return (h - mean) * jax.lax.rsqrt(var + EPS) * gamma + beta


def reference_forward(x, units, fc_out, cfg):
    it = iter(units)
    inp = x.astype(jnp.float32)
    h = inp
    for _ in range(2):
        W, b, g, be = next(it)
        h = _bn_train_ref(jnp.maximum(h @ W + b, 0.0), g, be)
    for _ in range(cfg["n_resblk1"]):
        h = jnp.concatenate([h, inp], axis=-1)
        for _ in range(2):
            W, b, g, be = next(it)
            h = _bn_train_ref(jnp.maximum(h @ W + b, 0.0), g, be)
    x_prev = h
    for _ in range(cfg["n_resblk2"]):
        h = jnp.concatenate([h, x_prev], axis=-1)
        W, b, g, be = next(it)
        h = _bn_train_ref(jnp.maximum(h @ W + b, 0.0), g, be)
    Wo, bo = fc_out
    return h @ Wo + bo


if __name__ == "__main__":
    cfg = {"d_in": 16, "d_out": 8, "d_hidden": 32, "n_resblk1": 2, "n_resblk2": 2}
    B = 8

    key = jax.random.PRNGKey(0)
    kx, kp = jax.random.split(key)
    x = jax.random.normal(kx, (B, cfg["d_in"]), jnp.float32)
    units, fc_out = init_params(kp, cfg)

    out = encoder_resnet_forward(x, units, fc_out, cfg)
    out = jax.block_until_ready(out)

    ref = reference_forward(x, units, fc_out, cfg)
    assert out.shape == (B, cfg["d_out"])
    assert jnp.allclose(out, ref, rtol=1e-4, atol=1e-4), (
        f"max abs err {jnp.max(jnp.abs(out - ref))}"
    )
    print("KERNEL_OK")
</pallas_src>

<mosaic_0001>
module attributes {stable_mosaic.version = 11 : i64} {
  func.func @_encoder_kernel(%arg0: memref<8x128xf32, #tpu.memory_space<vmem>>, %arg1: memref<13x128x128xf32, #tpu.memory_space<vmem>>, %arg2: memref<25x128xf32, #tpu.memory_space<vmem>>, %arg3: memref<8x128xf32, #tpu.memory_space<vmem>>) attributes {dimension_semantics = [], scalar_prefetch = 0 : i64, scratch_operands = 0 : i64, tpu.core_type = #tpu.core_type<tc>} {
    %c0 = arith.constant 0 : index
    %c0_0 = arith.constant 0 : index
    %0 = vector.load %arg0[%c0, %c0_0] : memref<8x128xf32, #tpu.memory_space<vmem>>, vector<8x128xf32>
    %c0_1 = arith.constant 0 : index
    %c0_2 = arith.constant 0 : index
    %c0_3 = arith.constant 0 : index
    %1 = vector.load %arg1[%c0_1, %c0_2, %c0_3] : memref<13x128x128xf32, #tpu.memory_space<vmem>>, vector<1x128x128xf32>
    %2 = vector.shape_cast %1 : vector<1x128x128xf32> to vector<128x128xf32>
    %cst = arith.constant dense<0.000000e+00> : vector<8x128xf32>
    %3 = tpu.matmul %0, %2, %cst {dimension_numbers = #tpu.dot_dimension_numbers<[1], [0], [0], [1], [0, 0, 1, 1], [], []>} : vector<8x128xf32>, vector<128x128xf32>, vector<8x128xf32> -> vector<8x128xf32>
    %c0_4 = arith.constant 0 : index
    %c0_5 = arith.constant 0 : index
    %4 = vector.load %arg2[%c0_4, %c0_5] : memref<25x128xf32, #tpu.memory_space<vmem>>, vector<1x128xf32>
    %5 = vector.broadcast %4 : vector<1x128xf32> to vector<8x128xf32>
    %6 = arith.addf %3, %5 : vector<8x128xf32>
    %cst_6 = arith.constant 0.000000e+00 : f32
    %7 = vector.broadcast %cst_6 : f32 to vector<8x128xf32>
    %8 = arith.maximumf %6, %7 : vector<8x128xf32>
    %cst_7 = arith.constant dense<0.000000e+00> : vector<128xf32>
    %9 = vector.multi_reduction <add>, %8, %cst_7 [0] : vector<8x128xf32> to vector<128xf32>
    %10 = vector.shape_cast %9 : vector<128xf32> to vector<1x128xf32>
    %11 = arith.mulf %8, %8 : vector<8x128xf32>
    %cst_8 = arith.constant dense<0.000000e+00> : vector<128xf32>
    %12 = vector.multi_reduction <add>, %11, %cst_8 [0] : vector<8x128xf32> to vector<128xf32>
    %13 = vector.shape_cast %12 : vector<128xf32> to vector<1x128xf32>
    %cst_9 = arith.constant 1.250000e-01 : f32
    %14 = vector.broadcast %cst_9 : f32 to vector<1x128xf32>
    %15 = arith.mulf %10, %14 : vector<1x128xf32>
    %cst_10 = arith.constant 1.250000e-01 : f32
    %16 = vector.broadcast %cst_10 : f32 to vector<1x128xf32>
    %17 = arith.mulf %13, %16 : vector<1x128xf32>
    %18 = arith.mulf %15, %15 : vector<1x128xf32>
    %19 = arith.subf %17, %18 : vector<1x128xf32>
    %c9 = arith.constant 9 : index
    %c0_11 = arith.constant 0 : index
    %20 = vector.load %arg2[%c9, %c0_11] : memref<25x128xf32, #tpu.memory_space<vmem>>, vector<1x128xf32>
    %cst_12 = arith.constant 9.99999974E-6 : f32
    %21 = vector.broadcast %cst_12 : f32 to vector<1x128xf32>
    %22 = arith.addf %19, %21 : vector<1x128xf32>
    %23 = math.rsqrt %22 : vector<1x128xf32>
    %24 = arith.mulf %20, %23 : vector<1x128xf32>
    %25 = vector.broadcast %15 : vector<1x128xf32> to vector<8x128xf32>
    %26 = arith.subf %8, %25 : vector<8x128xf32>
    %27 = vector.broadcast %24 : vector<1x128xf32> to vector<8x128xf32>
    %28 = arith.mulf %26, %27 : vector<8x128xf32>
    %c17 = arith.constant 17 : index
    %c0_13 = arith.constant 0 : index
    %29 = vector.load %arg2[%c17, %c0_13] : memref<25x128xf32, #tpu.memory_space<vmem>>, vector<1x128xf32>
    %30 = vector.broadcast %29 : vector<1x128xf32> to vector<8x128xf32>
    %31 = arith.addf %28, %30 : vector<8x128xf32>
    %c1 = arith.constant 1 : index
    %c0_14 = arith.constant 0 : index
    %c0_15 = arith.constant 0 : index
    %32 = vector.load %arg1[%c1, %c0_14, %c0_15] : memref<13x128x128xf32, #tpu.memory_space<vmem>>, vector<1x128x128xf32>
    %33 = vector.shape_cast %32 : vector<1x128x128xf32> to vector<128x128xf32>
    %cst_16 = arith.constant dense<0.000000e+00> : vector<8x128xf32>
    %34 = tpu.matmul %31, %33, %cst_16 {dimension_numbers = #tpu.dot_dimension_numbers<[1], [0], [0], [1], [0, 0, 1, 1], [], []>} : vector<8x128xf32>, vector<128x128xf32>, vector<8x128xf32> -> vector<8x128xf32>
    %c1_17 = arith.constant 1 : index
    %c0_18 = arith.constant 0 : index
    %35 = vector.load %arg2[%c1_17, %c0_18] : memref<25x128xf32, #tpu.memory_space<vmem>>, vector<1x128xf32>
    %36 = vector.broadcast %35 : vector<1x128xf32> to vector<8x128xf32>
    %37 = arith.addf %34, %36 : vector<8x128xf32>
    %cst_19 = arith.constant 0.000000e+00 : f32
    %38 = vector.broadcast %cst_19 : f32 to vector<8x128xf32>
    %39 = arith.maximumf %37, %38 : vector<8x128xf32>
    %cst_20 = arith.constant dense<0.000000e+00> : vector<128xf32>
    %40 = vector.multi_reduction <add>, %39, %cst_20 [0] : vector<8x128xf32> to vector<128xf32>
    %41 = vector.shape_cast %40 : vector<128xf32> to vector<1x128xf32>
    %42 = arith.mulf %39, %39 : vector<8x128xf32>
    %cst_21 = arith.constant dense<0.000000e+00> : vector<128xf32>
    %43 = vector.multi_reduction <add>, %42, %cst_21 [0] : vector<8x128xf32> to vector<128xf32>
    %44 = vector.shape_cast %43 : vector<128xf32> to vector<1x128xf32>
    %cst_22 = arith.constant 1.250000e-01 : f32
    %45 = vector.broadcast %cst_22 : f32 to vector<1x128xf32>
    %46 = arith.mulf %41, %45 : vector<1x128xf32>
    %cst_23 = arith.constant 1.250000e-01 : f32
    %47 = vector.broadcast %cst_23 : f32 to vector<1x128xf32>
    %48 = arith.mulf %44, %47 : vector<1x128xf32>
    %49 = arith.mulf %46, %46 : vector<1x128xf32>
    %50 = arith.subf %48, %49 : vector<1x128xf32>
    %c10 = arith.constant 10 : index
    %c0_24 = arith.constant 0 : index
    %51 = vector.load %arg2[%c10, %c0_24] : memref<25x128xf32, #tpu.memory_space<vmem>>, vector<1x128xf32>
    %cst_25 = arith.constant 9.99999974E-6 : f32
    %52 = vector.broadcast %cst_25 : f32 to vector<1x128xf32>
    %53 = arith.addf %50, %52 : vector<1x128xf32>
    %54 = math.rsqrt %53 : vector<1x128xf32>
    %55 = arith.mulf %51, %54 : vector<1x128xf32>
    %56 = vector.broadcast %46 : vector<1x128xf32> to vector<8x128xf32>
    %57 = arith.subf %39, %56 : vector<8x128xf32>
    %58 = vector.broadcast %55 : vector<1x128xf32> to vector<8x128xf32>
    %59 = arith.mulf %57, %58 : vector<8x128xf32>
    %c18 = arith.constant 18 : index
    %c0_26 = arith.constant 0 : index
    %60 = vector.load %arg2[%c18, %c0_26] : memref<25x128xf32, #tpu.memory_space<vmem>>, vector<1x128xf32>
    %61 = vector.broadcast %60 : vector<1x128xf32> to vector<8x128xf32>
    %62 = arith.addf %59, %61 : vector<8x128xf32>
    %c2 = arith.constant 2 : index
    %c0_27 = arith.constant 0 : index
    %c0_28 = arith.constant 0 : index
    %63 = vector.load %arg1[%c2, %c0_27, %c0_28] : memref<13x128x128xf32, #tpu.memory_space<vmem>>, vector<1x128x128xf32>
    %64 = vector.shape_cast %63 : vector<1x128x128xf32> to vector<128x128xf32>
    %cst_29 = arith.constant dense<0.000000e+00> : vector<8x128xf32>
    %65 = tpu.matmul %62, %64, %cst_29 {dimension_numbers = #tpu.dot_dimension_numbers<[1], [0], [0], [1], [0, 0, 1, 1], [], []>} : vector<8x128xf32>, vector<128x128xf32>, vector<8x128xf32> -> vector<8x128xf32>
    %c3 = arith.constant 3 : index
    %c0_30 = arith.constant 0 : index
    %c0_31 = arith.constant 0 : index
    %66 = vector.load %arg1[%c3, %c0_30, %c0_31] : memref<13x128x128xf32, #tpu.memory_space<vmem>>, vector<1x128x128xf32>
    %67 = vector.shape_cast %66 : vector<1x128x128xf32> to vector<128x128xf32>
    %cst_32 = arith.constant dense<0.000000e+00> : vector<8x128xf32>
    %68 = tpu.matmul %0, %67, %cst_32 {dimension_numbers = #tpu.dot_dimension_numbers<[1], [0], [0], [1], [0, 0, 1, 1], [], []>} : vector<8x128xf32>, vector<128x128xf32>, vector<8x128xf32> -> vector<8x128xf32>
    %69 = arith.addf %65, %68 : vector<8x128xf32>
    %c2_33 = arith.constant 2 : index
    %c0_34 = arith.constant 0 : index
    %70 = vector.load %arg2[%c2_33, %c0_34] : memref<25x128xf32, #tpu.memory_space<vmem>>, vector<1x128xf32>
    %71 = vector.broadcast %70 : vector<1x128xf32> to vector<8x128xf32>
    %72 = arith.addf %69, %71 : vector<8x128xf32>
    %cst_35 = arith.constant 0.000000e+00 : f32
    %73 = vector.broadcast %cst_35 : f32 to vector<8x128xf32>
    %74 = arith.maximumf %72, %73 : vector<8x128xf32>
    %cst_36 = arith.constant dense<0.000000e+00> : vector<128xf32>
    %75 = vector.multi_reduction <add>, %74, %cst_36 [0] : vector<8x128xf32> to vector<128xf32>
    %76 = vector.shape_cast %75 : vector<128xf32> to vector<1x128xf32>
    %77 = arith.mulf %74, %74 : vector<8x128xf32>
    %cst_37 = arith.constant dense<0.000000e+00> : vector<128xf32>
    %78 = vector.multi_reduction <add>, %77, %cst_37 [0] : vector<8x128xf32> to vector<128xf32>
    %79 = vector.shape_cast %78 : vector<128xf32> to vector<1x128xf32>
    %cst_38 = arith.constant 1.250000e-01 : f32
    %80 = vector.broadcast %cst_38 : f32 to vector<1x128xf32>
    %81 = arith.mulf %76, %80 : vector<1x128xf32>
    %cst_39 = arith.constant 1.250000e-01 : f32
    %82 = vector.broadcast %cst_39 : f32 to vector<1x128xf32>
    %83 = arith.mulf %79, %82 : vector<1x128xf32>
    %84 = arith.mulf %81, %81 : vector<1x128xf32>
    %85 = arith.subf %83, %84 : vector<1x128xf32>
    %c11 = arith.constant 11 : index
    %c0_40 = arith.constant 0 : index
    %86 = vector.load %arg2[%c11, %c0_40] : memref<25x128xf32, #tpu.memory_space<vmem>>, vector<1x128xf32>
    %cst_41 = arith.constant 9.99999974E-6 : f32
    %87 = vector.broadcast %cst_41 : f32 to vector<1x128xf32>
    %88 = arith.addf %85, %87 : vector<1x128xf32>
    %89 = math.rsqrt %88 : vector<1x128xf32>
    %90 = arith.mulf %86, %89 : vector<1x128xf32>
    %91 = vector.broadcast %81 : vector<1x128xf32> to vector<8x128xf32>
    %92 = arith.subf %74, %91 : vector<8x128xf32>
    %93 = vector.broadcast %90 : vector<1x128xf32> to vector<8x128xf32>
    %94 = arith.mulf %92, %93 : vector<8x128xf32>
    %c19 = arith.constant 19 : index
    %c0_42 = arith.constant 0 : index
    %95 = vector.load %arg2[%c19, %c0_42] : memref<25x128xf32, #tpu.memory_space<vmem>>, vector<1x128xf32>
    %96 = vector.broadcast %95 : vector<1x128xf32> to vector<8x128xf32>
    %97 = arith.addf %94, %96 : vector<8x128xf32>
    %c4 = arith.constant 4 : index
    %c0_43 = arith.constant 0 : index
    %c0_44 = arith.constant 0 : index
    %98 = vector.load %arg1[%c4, %c0_43, %c0_44] : memref<13x128x128xf32, #tpu.memory_space<vmem>>, vector<1x128x128xf32>
    %99 = vector.shape_cast %98 : vector<1x128x128xf32> to vector<128x128xf32>
    %cst_45 = arith.constant dense<0.000000e+00> : vector<8x128xf32>
    %100 = tpu.matmul %97, %99, %cst_45 {dimension_numbers = #tpu.dot_dimension_numbers<[1], [0], [0], [1], [0, 0, 1, 1], [], []>} : vector<8x128xf32>, vector<128x128xf32>, vector<8x128xf32> -> vector<8x128xf32>
    %c3_46 = arith.constant 3 : index
    %c0_47 = arith.constant 0 : index
    %101 = vector.load %arg2[%c3_46, %c0_47] : memref<25x128xf32, #tpu.memory_space<vmem>>, vector<1x128xf32>
    %102 = vector.broadcast %101 : vector<1x128xf32> to vector<8x128xf32>
    %103 = arith.addf %100, %102 : vector<8x128xf32>
    %cst_48 = arith.constant 0.000000e+00 : f32
    %104 = vector.broadcast %cst_48 : f32 to vector<8x128xf32>
    %105 = arith.maximumf %103, %104 : vector<8x128xf32>
    %cst_49 = arith.constant dense<0.000000e+00> : vector<128xf32>
    %106 = vector.multi_reduction <add>, %105, %cst_49 [0] : vector<8x128xf32> to vector<128xf32>
    %107 = vector.shape_cast %106 : vector<128xf32> to vector<1x128xf32>
    %108 = arith.mulf %105, %105 : vector<8x128xf32>
    %cst_50 = arith.constant dense<0.000000e+00> : vector<128xf32>
    %109 = vector.multi_reduction <add>, %108, %cst_50 [0] : vector<8x128xf32> to vector<128xf32>
    %110 = vector.shape_cast %109 : vector<128xf32> to vector<1x128xf32>
    %cst_51 = arith.constant 1.250000e-01 : f32
    %111 = vector.broadcast %cst_51 : f32 to vector<1x128xf32>
    %112 = arith.mulf %107, %111 : vector<1x128xf32>
    %cst_52 = arith.constant 1.250000e-01 : f32
    %113 = vector.broadcast %cst_52 : f32 to vector<1x128xf32>
    %114 = arith.mulf %110, %113 : vector<1x128xf32>
    %115 = arith.mulf %112, %112 : vector<1x128xf32>
    %116 = arith.subf %114, %115 : vector<1x128xf32>
    %c12 = arith.constant 12 : index
    %c0_53 = arith.constant 0 : index
    %117 = vector.load %arg2[%c12, %c0_53] : memref<25x128xf32, #tpu.memory_space<vmem>>, vector<1x128xf32>
    %cst_54 = arith.constant 9.99999974E-6 : f32
    %118 = vector.broadcast %cst_54 : f32 to vector<1x128xf32>
    %119 = arith.addf %116, %118 : vector<1x128xf32>
    %120 = math.rsqrt %119 : vector<1x128xf32>
    %121 = arith.mulf %117, %120 : vector<1x128xf32>
    %122 = vector.broadcast %112 : vector<1x128xf32> to vector<8x128xf32>
    %123 = arith.subf %105, %122 : vector<8x128xf32>
    %124 = vector.broadcast %121 : vector<1x128xf32> to vector<8x128xf32>
    %125 = arith.mulf %123, %124 : vector<8x128xf32>
    %c20 = arith.constant 20 : index
    %c0_55 = arith.constant 0 : index
    %126 = vector.load %arg2[%c20, %c0_55] : memref<25x128xf32, #tpu.memory_space<vmem>>, vector<1x128xf32>
    %127 = vector.broadcast %126 : vector<1x128xf32> to vector<8x128xf32>
    %128 = arith.addf %125, %127 : vector<8x128xf32>
    %c5 = arith.constant 5 : index
    %c0_56 = arith.constant 0 : index
    %c0_57 = arith.constant 0 : index
    %129 = vector.load %arg1[%c5, %c0_56, %c0_57] : memref<13x128x128xf32, #tpu.memory_space<vmem>>, vector<1x128x128xf32>
    %130 = vector.shape_cast %129 : vector<1x128x128xf32> to vector<128x128xf32>
    %cst_58 = arith.constant dense<0.000000e+00> : vector<8x128xf32>
    %131 = tpu.matmul %128, %130, %cst_58 {dimension_numbers = #tpu.dot_dimension_numbers<[1], [0], [0], [1], [0, 0, 1, 1], [], []>} : vector<8x128xf32>, vector<128x128xf32>, vector<8x128xf32> -> vector<8x128xf32>
    %c6 = arith.constant 6 : index
    %c0_59 = arith.constant 0 : index
    %c0_60 = arith.constant 0 : index
    %132 = vector.load %arg1[%c6, %c0_59, %c0_60] : memref<13x128x128xf32, #tpu.memory_space<vmem>>, vector<1x128x128xf32>
    %133 = vector.shape_cast %132 : vector<1x128x128xf32> to vector<128x128xf32>
    %cst_61 = arith.constant dense<0.000000e+00> : vector<8x128xf32>
    %134 = tpu.matmul %0, %133, %cst_61 {dimension_numbers = #tpu.dot_dimension_numbers<[1], [0], [0], [1], [0, 0, 1, 1], [], []>} : vector<8x128xf32>, vector<128x128xf32>, vector<8x128xf32> -> vector<8x128xf32>
    %135 = arith.addf %131, %134 : vector<8x128xf32>
    %c4_62 = arith.constant 4 : index
    %c0_63 = arith.constant 0 : index
    %136 = vector.load %arg2[%c4_62, %c0_63] : memref<25x128xf32, #tpu.memory_space<vmem>>, vector<1x128xf32>
    %137 = vector.broadcast %136 : vector<1x128xf32> to vector<8x128xf32>
    %138 = arith.addf %135, %137 : vector<8x128xf32>
    %cst_64 = arith.constant 0.000000e+00 : f32
    %139 = vector.broadcast %cst_64 : f32 to vector<8x128xf32>
    %140 = arith.maximumf %138, %139 : vector<8x128xf32>
    %cst_65 = arith.constant dense<0.000000e+00> : vector<128xf32>
    %141 = vector.multi_reduction <add>, %140, %cst_65 [0] : vector<8x128xf32> to vector<128xf32>
    %142 = vector.shape_cast %141 : vector<128xf32> to vector<1x128xf32>
    %143 = arith.mulf %140, %140 : vector<8x128xf32>
    %cst_66 = arith.constant dense<0.000000e+00> : vector<128xf32>
    %144 = vector.multi_reduction <add>, %143, %cst_66 [0] : vector<8x128xf32> to vector<128xf32>
    %145 = vector.shape_cast %144 : vector<128xf32> to vector<1x128xf32>
    %cst_67 = arith.constant 1.250000e-01 : f32
    %146 = vector.broadcast %cst_67 : f32 to vector<1x128xf32>
    %147 = arith.mulf %142, %146 : vector<1x128xf32>
    %cst_68 = arith.constant 1.250000e-01 : f32
    %148 = vector.broadcast %cst_68 : f32 to vector<1x128xf32>
    %149 = arith.mulf %145, %148 : vector<1x128xf32>
    %150 = arith.mulf %147, %147 : vector<1x128xf32>
    %151 = arith.subf %149, %150 : vector<1x128xf32>
    %c13 = arith.constant 13 : index
    %c0_69 = arith.constant 0 : index
    %152 = vector.load %arg2[%c13, %c0_69] : memref<25x128xf32, #tpu.memory_space<vmem>>, vector<1x128xf32>
    %cst_70 = arith.constant 9.99999974E-6 : f32
    %153 = vector.broadcast %cst_70 : f32 to vector<1x128xf32>
    %154 = arith.addf %151, %153 : vector<1x128xf32>
    %155 = math.rsqrt %154 : vector<1x128xf32>
    %156 = arith.mulf %152, %155 : vector<1x128xf32>
    %157 = vector.broadcast %147 : vector<1x128xf32> to vector<8x128xf32>
    %158 = arith.subf %140, %157 : vector<8x128xf32>
    %159 = vector.broadcast %156 : vector<1x128xf32> to vector<8x128xf32>
    %160 = arith.mulf %158, %159 : vector<8x128xf32>
    %c21 = arith.constant 21 : index
    %c0_71 = arith.constant 0 : index
    %161 = vector.load %arg2[%c21, %c0_71] : memref<25x128xf32, #tpu.memory_space<vmem>>, vector<1x128xf32>
    %162 = vector.broadcast %161 : vector<1x128xf32> to vector<8x128xf32>
    %163 = arith.addf %160, %162 : vector<8x128xf32>
    %c7 = arith.constant 7 : index
    %c0_72 = arith.constant 0 : index
    %c0_73 = arith.constant 0 : index
    %164 = vector.load %arg1[%c7, %c0_72, %c0_73] : memref<13x128x128xf32, #tpu.memory_space<vmem>>, vector<1x128x128xf32>
    %165 = vector.shape_cast %164 : vector<1x128x128xf32> to vector<128x128xf32>
    %cst_74 = arith.constant dense<0.000000e+00> : vector<8x128xf32>
    %166 = tpu.matmul %163, %165, %cst_74 {dimension_numbers = #tpu.dot_dimension_numbers<[1], [0], [0], [1], [0, 0, 1, 1], [], []>} : vector<8x128xf32>, vector<128x128xf32>, vector<8x128xf32> -> vector<8x128xf32>
    %c5_75 = arith.constant 5 : index
    %c0_76 = arith.constant 0 : index
    %167 = vector.load %arg2[%c5_75, %c0_76] : memref<25x128xf32, #tpu.memory_space<vmem>>, vector<1x128xf32>
    %168 = vector.broadcast %167 : vector<1x128xf32> to vector<8x128xf32>
    %169 = arith.addf %166, %168 : vector<8x128xf32>
    %cst_77 = arith.constant 0.000000e+00 : f32
    %170 = vector.broadcast %cst_77 : f32 to vector<8x128xf32>
    %171 = arith.maximumf %169, %170 : vector<8x128xf32>
    %cst_78 = arith.constant dense<0.000000e+00> : vector<128xf32>
    %172 = vector.multi_reduction <add>, %171, %cst_78 [0] : vector<8x128xf32> to vector<128xf32>
    %173 = vector.shape_cast %172 : vector<128xf32> to vector<1x128xf32>
    %174 = arith.mulf %171, %171 : vector<8x128xf32>
    %cst_79 = arith.constant dense<0.000000e+00> : vector<128xf32>
    %175 = vector.multi_reduction <add>, %174, %cst_79 [0] : vector<8x128xf32> to vector<128xf32>
    %176 = vector.shape_cast %175 : vector<128xf32> to vector<1x128xf32>
    %cst_80 = arith.constant 1.250000e-01 : f32
    %177 = vector.broadcast %cst_80 : f32 to vector<1x128xf32>
    %178 = arith.mulf %173, %177 : vector<1x128xf32>
    %cst_81 = arith.constant 1.250000e-01 : f32
    %179 = vector.broadcast %cst_81 : f32 to vector<1x128xf32>
    %180 = arith.mulf %176, %179 : vector<1x128xf32>
    %181 = arith.mulf %178, %178 : vector<1x128xf32>
    %182 = arith.subf %180, %181 : vector<1x128xf32>
    %c14 = arith.constant 14 : index
    %c0_82 = arith.constant 0 : index
    %183 = vector.load %arg2[%c14, %c0_82] : memref<25x128xf32, #tpu.memory_space<vmem>>, vector<1x128xf32>
    %cst_83 = arith.constant 9.99999974E-6 : f32
    %184 = vector.broadcast %cst_83 : f32 to vector<1x128xf32>
    %185 = arith.addf %182, %184 : vector<1x128xf32>
    %186 = math.rsqrt %185 : vector<1x128xf32>
    %187 = arith.mulf %183, %186 : vector<1x128xf32>
    %188 = vector.broadcast %178 : vector<1x128xf32> to vector<8x128xf32>
    %189 = arith.subf %171, %188 : vector<8x128xf32>
    %190 = vector.broadcast %187 : vector<1x128xf32> to vector<8x128xf32>
    %191 = arith.mulf %189, %190 : vector<8x128xf32>
    %c22 = arith.constant 22 : index
    %c0_84 = arith.constant 0 : index
    %192 = vector.load %arg2[%c22, %c0_84] : memref<25x128xf32, #tpu.memory_space<vmem>>, vector<1x128xf32>
    %193 = vector.broadcast %192 : vector<1x128xf32> to vector<8x128xf32>
    %194 = arith.addf %191, %193 : vector<8x128xf32>
    %c8 = arith.constant 8 : index
    %c0_85 = arith.constant 0 : index
    %c0_86 = arith.constant 0 : index
    %195 = vector.load %arg1[%c8, %c0_85, %c0_86] : memref<13x128x128xf32, #tpu.memory_space<vmem>>, vector<1x128x128xf32>
    %196 = vector.shape_cast %195 : vector<1x128x128xf32> to vector<128x128xf32>
    %cst_87 = arith.constant dense<0.000000e+00> : vector<8x128xf32>
    %197 = tpu.matmul %194, %196, %cst_87 {dimension_numbers = #tpu.dot_dimension_numbers<[1], [0], [0], [1], [0, 0, 1, 1], [], []>} : vector<8x128xf32>, vector<128x128xf32>, vector<8x128xf32> -> vector<8x128xf32>
    %c9_88 = arith.constant 9 : index
    %c0_89 = arith.constant 0 : index
    %c0_90 = arith.constant 0 : index
    %198 = vector.load %arg1[%c9_88, %c0_89, %c0_90] : memref<13x128x128xf32, #tpu.memory_space<vmem>>, vector<1x128x128xf32>
    %199 = vector.shape_cast %198 : vector<1x128x128xf32> to vector<128x128xf32>
    %cst_91 = arith.constant dense<0.000000e+00> : vector<8x128xf32>
    %200 = tpu.matmul %194, %199, %cst_91 {dimension_numbers = #tpu.dot_dimension_numbers<[1], [0], [0], [1], [0, 0, 1, 1], [], []>} : vector<8x128xf32>, vector<128x128xf32>, vector<8x128xf32> -> vector<8x128xf32>
    %201 = arith.addf %197, %200 : vector<8x128xf32>
    %c6_92 = arith.constant 6 : index
    %c0_93 = arith.constant 0 : index
    %202 = vector.load %arg2[%c6_92, %c0_93] : memref<25x128xf32, #tpu.memory_space<vmem>>, vector<1x128xf32>
    %203 = vector.broadcast %202 : vector<1x128xf32> to vector<8x128xf32>
    %204 = arith.addf %201, %203 : vector<8x128xf32>
    %cst_94 = arith.constant 0.000000e+00 : f32
    %205 = vector.broadcast %cst_94 : f32 to vector<8x128xf32>
    %206 = arith.maximumf %204, %205 : vector<8x128xf32>
    %cst_95 = arith.constant dense<0.000000e+00> : vector<128xf32>
    %207 = vector.multi_reduction <add>, %206, %cst_95 [0] : vector<8x128xf32> to vector<128xf32>
    %208 = vector.shape_cast %207 : vector<128xf32> to vector<1x128xf32>
    %209 = arith.mulf %206, %206 : vector<8x128xf32>
    %cst_96 = arith.constant dense<0.000000e+00> : vector<128xf32>
    %210 = vector.multi_reduction <add>, %209, %cst_96 [0] : vector<8x128xf32> to vector<128xf32>
    %211 = vector.shape_cast %210 : vector<128xf32> to vector<1x128xf32>
    %cst_97 = arith.constant 1.250000e-01 : f32
    %212 = vector.broadcast %cst_97 : f32 to vector<1x128xf32>
    %213 = arith.mulf %208, %212 : vector<1x128xf32>
    %cst_98 = arith.constant 1.250000e-01 : f32
    %214 = vector.broadcast %cst_98 : f32 to vector<1x128xf32>
    %215 = arith.mulf %211, %214 : vector<1x128xf32>
    %216 = arith.mulf %213, %213 : vector<1x128xf32>
    %217 = arith.subf %215, %216 : vector<1x128xf32>
    %c15 = arith.constant 15 : index
    %c0_99 = arith.constant 0 : index
    %218 = vector.load %arg2[%c15, %c0_99] : memref<25x128xf32, #tpu.memory_space<vmem>>, vector<1x128xf32>
    %cst_100 = arith.constant 9.99999974E-6 : f32
    %219 = vector.broadcast %cst_100 : f32 to vector<1x128xf32>
    %220 = arith.addf %217, %219 : vector<1x128xf32>
    %221 = math.rsqrt %220 : vector<1x128xf32>
    %222 = arith.mulf %218, %221 : vector<1x128xf32>
    %223 = vector.broadcast %213 : vector<1x128xf32> to vector<8x128xf32>
    %224 = arith.subf %206, %223 : vector<8x128xf32>
    %225 = vector.broadcast %222 : vector<1x128xf32> to vector<8x128xf32>
    %226 = arith.mulf %224, %225 : vector<8x128xf32>
    %c23 = arith.constant 23 : index
    %c0_101 = arith.constant 0 : index
    %227 = vector.load %arg2[%c23, %c0_101] : memref<25x128xf32, #tpu.memory_space<vmem>>, vector<1x128xf32>
    %228 = vector.broadcast %227 : vector<1x128xf32> to vector<8x128xf32>
    %229 = arith.addf %226, %228 : vector<8x128xf32>
    %c10_102 = arith.constant 10 : index
    %c0_103 = arith.constant 0 : index
    %c0_104 = arith.constant 0 : index
    %230 = vector.load %arg1[%c10_102, %c0_103, %c0_104] : memref<13x128x128xf32, #tpu.memory_space<vmem>>, vector<1x128x128xf32>
    %231 = vector.shape_cast %230 : vector<1x128x128xf32> to vector<128x128xf32>
    %cst_105 = arith.constant dense<0.000000e+00> : vector<8x128xf32>
    %232 = tpu.matmul %229, %231, %cst_105 {dimension_numbers = #tpu.dot_dimension_numbers<[1], [0], [0], [1], [0, 0, 1, 1], [], []>} : vector<8x128xf32>, vector<128x128xf32>, vector<8x128xf32> -> vector<8x128xf32>
    %c11_106 = arith.constant 11 : index
    %c0_107 = arith.constant 0 : index
    %c0_108 = arith.constant 0 : index
    %233 = vector.load %arg1[%c11_106, %c0_107, %c0_108] : memref<13x128x128xf32, #tpu.memory_space<vmem>>, vector<1x128x128xf32>
    %234 = vector.shape_cast %233 : vector<1x128x128xf32> to vector<128x128xf32>
    %cst_109 = arith.constant dense<0.000000e+00> : vector<8x128xf32>
    %235 = tpu.matmul %194, %234, %cst_109 {dimension_numbers = #tpu.dot_dimension_numbers<[1], [0], [0], [1], [0, 0, 1, 1], [], []>} : vector<8x128xf32>, vector<128x128xf32>, vector<8x128xf32> -> vector<8x128xf32>
    %236 = arith.addf %232, %235 : vector<8x128xf32>
    %c7_110 = arith.constant 7 : index
    %c0_111 = arith.constant 0 : index
    %237 = vector.load %arg2[%c7_110, %c0_111] : memref<25x128xf32, #tpu.memory_space<vmem>>, vector<1x128xf32>
    %238 = vector.broadcast %237 : vector<1x128xf32> to vector<8x128xf32>
    %239 = arith.addf %236, %238 : vector<8x128xf32>
    %cst_112 = arith.constant 0.000000e+00 : f32
    %240 = vector.broadcast %cst_112 : f32 to vector<8x128xf32>
    %241 = arith.maximumf %239, %240 : vector<8x128xf32>
    %cst_113 = arith.constant dense<0.000000e+00> : vector<128xf32>
    %242 = vector.multi_reduction <add>, %241, %cst_113 [0] : vector<8x128xf32> to vector<128xf32>
    %243 = vector.shape_cast %242 : vector<128xf32> to vector<1x128xf32>
    %244 = arith.mulf %241, %241 : vector<8x128xf32>
    %cst_114 = arith.constant dense<0.000000e+00> : vector<128xf32>
    %245 = vector.multi_reduction <add>, %244, %cst_114 [0] : vector<8x128xf32> to vector<128xf32>
    %246 = vector.shape_cast %245 : vector<128xf32> to vector<1x128xf32>
    %cst_115 = arith.constant 1.250000e-01 : f32
    %247 = vector.broadcast %cst_115 : f32 to vector<1x128xf32>
    %248 = arith.mulf %243, %247 : vector<1x128xf32>
    %cst_116 = arith.constant 1.250000e-01 : f32
    %249 = vector.broadcast %cst_116 : f32 to vector<1x128xf32>
    %250 = arith.mulf %246, %249 : vector<1x128xf32>
    %251 = arith.mulf %248, %248 : vector<1x128xf32>
    %252 = arith.subf %250, %251 : vector<1x128xf32>
    %c16 = arith.constant 16 : index
    %c0_117 = arith.constant 0 : index
    %253 = vector.load %arg2[%c16, %c0_117] : memref<25x128xf32, #tpu.memory_space<vmem>>, vector<1x128xf32>
    %cst_118 = arith.constant 9.99999974E-6 : f32
    %254 = vector.broadcast %cst_118 : f32 to vector<1x128xf32>
    %255 = arith.addf %252, %254 : vector<1x128xf32>
    %256 = math.rsqrt %255 : vector<1x128xf32>
    %257 = arith.mulf %253, %256 : vector<1x128xf32>
    %258 = vector.broadcast %248 : vector<1x128xf32> to vector<8x128xf32>
    %259 = arith.subf %241, %258 : vector<8x128xf32>
    %260 = vector.broadcast %257 : vector<1x128xf32> to vector<8x128xf32>
    %261 = arith.mulf %259, %260 : vector<8x128xf32>
    %c24 = arith.constant 24 : index
    %c0_119 = arith.constant 0 : index
    %262 = vector.load %arg2[%c24, %c0_119] : memref<25x128xf32, #tpu.memory_space<vmem>>, vector<1x128xf32>
    %263 = vector.broadcast %262 : vector<1x128xf32> to vector<8x128xf32>
    %264 = arith.addf %261, %263 : vector<8x128xf32>
    %c12_120 = arith.constant 12 : index
    %c0_121 = arith.constant 0 : index
    %c0_122 = arith.constant 0 : index
    %265 = vector.load %arg1[%c12_120, %c0_121, %c0_122] : memref<13x128x128xf32, #tpu.memory_space<vmem>>, vector<1x128x128xf32>
    %266 = vector.shape_cast %265 : vector<1x128x128xf32> to vector<128x128xf32>
    %cst_123 = arith.constant dense<0.000000e+00> : vector<8x128xf32>
    %267 = tpu.matmul %264, %266, %cst_123 {dimension_numbers = #tpu.dot_dimension_numbers<[1], [0], [0], [1], [0, 0, 1, 1], [], []>} : vector<8x128xf32>, vector<128x128xf32>, vector<8x128xf32> -> vector<8x128xf32>
    %c8_124 = arith.constant 8 : index
    %c0_125 = arith.constant 0 : index
    %268 = vector.load %arg2[%c8_124, %c0_125] : memref<25x128xf32, #tpu.memory_space<vmem>>, vector<1x128xf32>
    %269 = vector.broadcast %268 : vector<1x128xf32> to vector<8x128xf32>
    %270 = arith.addf %267, %269 : vector<8x128xf32>
    %c0_126 = arith.constant 0 : index
    %c0_127 = arith.constant 0 : index
    %271 = vector.load %arg3[%c0_126, %c0_127] : memref<8x128xf32, #tpu.memory_space<vmem>>, vector<8x128xf32>
    tpu.vector_store %arg3[%c0_126, %c0_127], %270 {strides = array<i32>} : memref<8x128xf32, #tpu.memory_space<vmem>>, vector<8x128xf32>,
    return
  }
}

</mosaic_0001>

<bundles_post_ra>
// kernel: tpu_custom_call.1
= control target key start
LH: loop header
LB: loop body
LE: loop exit
PB: predicated region body
PF: predicated region fallthrough
CT: control target
= control target key end

     0   :  { %8 = vsyncpa [#allocation3], 0  ;;  %s2875_s0 = inlined_call_operand.hbm [shape: f32[8,128], index: 0, kind: input, shape index: {}]   ;;  %s2876_s1 = inlined_call_operand.hbm [shape: f32[13,128,128], index: 1, kind: input, shape index: {}]   ;;  %s2877_s2 = inlined_call_operand.hbm [shape: f32[25,128], index: 2, kind: input, shape index: {}]   ;;  %s2878_s3 = inlined_call_operand.hbm [shape: f32[8,128], index: 3, kind: output, shape index: {}]  }
   0x1   :  { %9 = vsyncpa [#allocation6], 0 }
   0x2   :  { %10 = vsyncpa [#allocation4], 0  ;;  %s2647_s12 = smov [#allocation5]   ;;  %s2553_s16 = scalar_lea.hbm %s2876_s1, 26624 }
   0x3   :  { %s26_s13 = sshll.u32 %s2647_s12, 4  ;;  %p2554_p0 = scmp.ne.s32.totalorder %s2876_s1, %s2553_s16  ;;  %s27_s13 = int_to_ptr.vmem [resolvable:$true] %s26_s13 }
   0x4   :  { %p2557_p1 = scmp.lt.u32.totalorder %s2553_s16, %s2876_s1 }
   0x6   :  { %p2559_p2 = pnand %p2557_p1, %p2554_p0 }
   0x8   :  { %2562 = shalt.err (!%p2559_p2)
}
   0x9   :  { %s2563_s21 = scalar_lea.vmem %s27_s13, 26624  ;;  %p2568_p4 = scmp.lt.s32.totalorder %s27_s13, %s27_s13 }
   0xa   :  { %p2564_p3 = scmp.ne.s32.totalorder %s27_s13, %s2563_s21  ;;  %p2569_p5 = scmp.lt.s32.totalorder %s2563_s21, %s2563_s21 }
   0xc   :  { %p2570_p6 = por %p2569_p5, %p2568_p4 }
   0xe   :  { %p2571_p7 = pnand %p2570_p6, %p2564_p3 }
  0x10   :  { %2574 = shalt.err (!%p2571_p7)
}
  0x11   :  { %s2648_s22 = smov 128   ;;  %s2649_s23 = smov 8  }
  0x12   :  { %32 = dma.hbm_to_vmem [thread:$0]  %s2876_s1, 26624, %s27_s13, [#allocation6], %s2648_s22, %s2648_s22, %s2649_s23  }
  0x13   :  { %s2650_s26 = smov [#allocation2]   ;;  %s2651_s28 = smov [#allocation7]  }
  0x14   :  { %s17_s27 = sshll.u32 %s2650_s26, 4  ;;  %s38_s29 = sshll.u32 %s2651_s28, 4  ;;  %s18_s27 = int_to_ptr.vmem [resolvable:$true] %s17_s27  ;;  %s39_s29 = int_to_ptr.vmem [resolvable:$true] %s38_s29 }
  0x15   :  { %s2575_s5 = scalar_lea.hbm %s2875_s0, 128 }
  0x16   :  { %p2576_p8 = scmp.ne.s32.totalorder %s2875_s0, %s2575_s5  ;;  %p2579_p9 = scmp.lt.u32.totalorder %s2575_s5, %s2875_s0 }
  0x18   :  { %p2581_p10 = pnand %p2579_p9, %p2576_p8 }
  0x1a   :  { %2584 = shalt.err (!%p2581_p10)
}
  0x1b   :  { %s2585_s1 = scalar_lea.vmem %s18_s27, 128  ;;  %p2590_p12 = scmp.lt.s32.totalorder %s18_s27, %s18_s27 }
  0x1c   :  { %p2586_p11 = scmp.ne.s32.totalorder %s18_s27, %s2585_s1  ;;  %p2591_p13 = scmp.lt.s32.totalorder %s2585_s1, %s2585_s1 }
  0x1e   :  { %p2592_p0 = por %p2591_p13, %p2590_p12 }
  0x20   :  { %p2593_p1 = pnand %p2592_p0, %p2586_p11 }
  0x22   :  { %2596 = shalt.err (!%p2593_p1)
}
  0x23   :  { %20 = dma.hbm_to_vmem [thread:$0]  %s2875_s0, 128, %s18_s27, [#allocation3]  }
  0x24   :  { %s2597_s14 = scalar_lea.hbm %s2877_s2, 512 }
  0x25   :  { %p2598_p2 = scmp.ne.s32.totalorder %s2877_s2, %s2597_s14  ;;  %p2601_p3 = scmp.lt.u32.totalorder %s2597_s14, %s2877_s2 }
  0x27   :  { %p2603_p4 = pnand %p2601_p3, %p2598_p2 }
  0x29   :  { %2606 = shalt.err (!%p2603_p4)
}
  0x2a   :  { %s2607_s19 = scalar_lea.vmem %s39_s29, 512  ;;  %p2612_p6 = scmp.lt.s32.totalorder %s39_s29, %s39_s29 }
  0x2b   :  { %p2608_p5 = scmp.ne.s32.totalorder %s39_s29, %s2607_s19  ;;  %p2613_p7 = scmp.lt.s32.totalorder %s2607_s19, %s2607_s19 }
  0x2d   :  { %p2614_p8 = por %p2613_p7, %p2612_p6 }
  0x2f   :  { %p2615_p9 = pnand %p2614_p8, %p2608_p5 }
  0x31   :  { %2618 = shalt.err (!%p2615_p9)
}
  0x32   :  { %44 = dma.hbm_to_vmem [thread:$0]  %s2877_s2, 512, %s39_s29, [#allocation6], %s2648_s22, %s2648_s22, %s2649_s23  }
  0x33   :  { %2641 = dma.done.wait [#allocation3], 128  }
  0x34   :  { %2642 = vsyncadd [#allocation3], 4294967168 }
  0x35   :  { %2643 = dma.done.wait [#allocation6], 27136  }
  0x36   :  { %2644 = vsyncadd [#allocation6], 4294940160  ;;  %v2652_v0 = vmov 0.0|0.0   ;;  %vm2653_vm0 = vmmov 0   ;;  %v2654_v1 = vmov 0.0   ;;  %v55_v2 = vld [vmem:[#allocation5] sm:$0xff] }
  0x37   :  { %2216 = vmatprep.subr.bf16.mxu0 %v2652_v0  ;;  %1793 = vmatprep.mubr.msk.f32.mxu0 %vm2653_vm0, %v2654_v1  ;;  %v56_v3 = vld [vmem:[#allocation5 + $0x8] sm:$0xff]  ;;  %v57_v4 = vld [vmem:[#allocation5 + $0x10] sm:$0xff]  ;;  %v58_v6 = vld [vmem:[#allocation5 + $0x18] sm:$0xff]  ;;  %s2655_s2 = smov [#allocation8]  }
  0x38   :  { %2240 = vmatprep.subr.bf16.mxu1 %v2652_v0  ;;  %1828 = vmatprep.mubr.msk.f32.mxu1 %vm2653_vm0, %v2654_v1  ;;  %v2217_v5 = vpack.c.bf16 %v56_v3, %v55_v2  ;;  %v2220_v7 = vpack.c.bf16 %v58_v6, %v57_v4  ;;  %v59_v8 = vld [vmem:[#allocation5 + $0x20] sm:$0xff]  ;;  %v60_v9 = vld [vmem:[#allocation5 + $0x28] sm:$0xff]  ;;  %v61_v11 = vld [vmem:[#allocation5 + $0x30] sm:$0xff]  ;;  %s1513_s21 = sshll.u32 %s2655_s2, 4  ;;  %s1514_s21 = int_to_ptr.vmem [resolvable:$true] %s1513_s21 }
  0x39   :  { %v2223_v10 = vpack.c.bf16 %v60_v9, %v59_v8  ;;  %v62_v12 = vld [vmem:[#allocation5 + $0x38] sm:$0xff]  ;;  %v63_v14 = vld [vmem:[#allocation5 + $0x40] sm:$0xff]  ;;  %v64_v15 = vld [vmem:[#allocation5 + $0x48] sm:$0xff]  ;;  %s2619_s22 = scalar_lea.vmem %s1514_s21, 128  ;;  %p2624_p11 = scmp.lt.s32.totalorder %s1514_s21, %s1514_s21 }
  0x3a   :  { %2218 = vmatpush3.bf16.msra.mxu0 %v2217_v5  ;;  %v2226_v13 = vpack.c.bf16 %v62_v12, %v61_v11  ;;  %v2229_v16 = vpack.c.bf16 %v64_v15, %v63_v14  ;;  %v65_v17 = vld [vmem:[#allocation5 + $0x50] sm:$0xff]  ;;  %v66_v18 = vld [vmem:[#allocation5 + $0x58] sm:$0xff]  ;;  %v67_v20 = vld [vmem:[#allocation5 + $0x60] sm:$0xff]  ;;  %v169_v12 = vlaneseq  ;;  %p2620_p10 = scmp.ne.s32.totalorder %s1514_s21, %s2619_s22  ;;  %p2625_p12 = scmp.lt.s32.totalorder %s2619_s22, %s2619_s22 }
  0x3b   :  { %2219 = vmatprep.subr.bf16.mxu0 %v2652_v0  ;;  %v2232_v19 = vpack.c.bf16 %v66_v18, %v65_v17  ;;  %v68_v21 = vld [vmem:[#allocation5 + $0x68] sm:$0xff]  ;;  %v69_v23 = vld [vmem:[#allocation5 + $0x70] sm:$0xff]  ;;  %v70_v24 = vld [vmem:[#allocation5 + $0x78] sm:$0xff] }
  0x3c   :  { %v2235_v22 = vpack.c.bf16 %v68_v21, %v67_v20  ;;  %v2238_v25 = vpack.c.bf16 %v70_v24, %v69_v23  ;;  %v2731_v26 = vld [vmem:[#allocation2] sm:$0xff]  ;;  %v181_v27 = vld [vmem:[#allocation5 + $0x80] sm:$0xff]  ;;  %v182_v28 = vld [vmem:[#allocation5 + $0x88] sm:$0xff]  ;;  %p2626_p13 = por %p2625_p12, %p2624_p11 }
  0x3d   :  { %v2241_v29 = vpack.c.bf16 %v182_v28, %v181_v27  ;;  %v183_v30 = vld [vmem:[#allocation5 + $0x90] sm:$0xff]  ;;  %v184_v31 = vld [vmem:[#allocation5 + $0x98] sm:$0xff]  ;;  %v185_v33 = vld [vmem:[#allocation5 + $0xa0] sm:$0xff] }
  0x3e   :  { %2221 = vmatpush3.bf16.msra.mxu0 %v2220_v7  ;;  %v2244_v32 = vpack.c.bf16 %v184_v31, %v183_v30  ;;  %v186_v34 = vld [vmem:[#allocation5 + $0xa8] sm:$0xff]  ;;  %v187_v36 = vld [vmem:[#allocation5 + $0xb0] sm:$0xff]  ;;  %v188_v37 = vld [vmem:[#allocation5 + $0xb8] sm:$0xff]  ;;  %p2627_p0 = pnand %p2626_p13, %p2620_p10 }
  0x3f   :  { %2222 = vmatprep.subr.bf16.mxu0 %v2652_v0  ;;  %2242 = vmatpush3.bf16.msra.mxu1 %v2241_v29  ;;  %v2247_v35 = vpack.c.bf16 %v186_v34, %v185_v33  ;;  %v2250_v38 = vpack.c.bf16 %v188_v37, %v187_v36  ;;  %v189_v39 = vld [vmem:[#allocation5 + $0xc0] sm:$0xff]  ;;  %v190_v40 = vld [vmem:[#allocation5 + $0xc8] sm:$0xff]  ;;  %v191_v42 = vld [vmem:[#allocation5 + $0xd0] sm:$0xff] }
  0x40   :  { %2243 = vmatprep.subr.bf16.mxu1 %v2652_v0  ;;  %v2253_v41 = vpack.c.bf16 %v190_v40, %v189_v39  ;;  %v192_v43 = vld [vmem:[#allocation5 + $0xd8] sm:$0xff]  ;;  %v193_v45 = vld [vmem:[#allocation5 + $0xe0] sm:$0xff]  ;;  %v194_v46 = vld [vmem:[#allocation5 + $0xe8] sm:$0xff] }
  0x41   :  { %v2256_v44 = vpack.c.bf16 %v192_v43, %v191_v42  ;;  %v2259_v47 = vpack.c.bf16 %v194_v46, %v193_v45  ;;  %v195_v48 = vld [vmem:[#allocation5 + $0xf0] sm:$0xff]  ;;  %v196_v49 = vld [vmem:[#allocation5 + $0xf8] sm:$0xff]  ;;  %v1523_v51 = vld [vmem:[#allocation7] ss:$0 sm:$0xff] }
  0x42   :  { %2224 = vmatpush3.bf16.msra.mxu0 %v2223_v10  ;;  %v2262_v50 = vpack.c.bf16 %v196_v49, %v195_v48  ;;  %v164_v14 = vld [vmem:[#allocation7 + $0x9] sm:$0x1]  ;;  %v1524_v20 = vld [vmem:[#allocation7 + $0x11] ss:$0 sm:$0xff]  ;;  %v324_v23 = vld [vmem:[#allocation5 + $0x180] sm:$0xff] }
  0x43   :  { %2225 = vmatprep.subr.bf16.mxu0 %v2652_v0  ;;  %2245 = vmatpush3.bf16.msra.mxu1 %v2244_v32  ;;  %v325_v24 = vld [vmem:[#allocation5 + $0x188] sm:$0xff]  ;;  %v307_v27 = vld [vmem:[#allocation5 + $0x100] sm:$0xff]  ;;  %v326_v30 = vld [vmem:[#allocation5 + $0x190] sm:$0xff] }
  0x44   :  { %2246 = vmatprep.subr.bf16.mxu1 %v2652_v0  ;;  %v308_v28 = vld [vmem:[#allocation5 + $0x108] sm:$0xff]  ;;  %v327_v31 = vld [vmem:[#allocation5 + $0x198] sm:$0xff]  ;;  %v309_v33 = vld [vmem:[#allocation5 + $0x110] sm:$0xff] }
  0x45   :  { %v2289_v29 = vpack.c.bf16 %v308_v28, %v307_v27  ;;  %v2268_v32 = vpack.c.bf16 %v327_v31, %v326_v30  ;;  %v310_v34 = vld [vmem:[#allocation5 + $0x118] sm:$0xff]  ;;  %v328_v36 = vld [vmem:[#allocation5 + $0x1a0] sm:$0xff]  ;;  %v329_v37 = vld [vmem:[#allocation5 + $0x1a8] sm:$0xff] }
  0x46   :  { %2227 = vmatpush3.bf16.msra.mxu0 %v2226_v13  ;;  %v170_v13 = vshrl.u32 %v169_v12, 7  ;;  %v311_v39 = vld [vmem:[#allocation5 + $0x120] sm:$0xff]  ;;  %v312_v40 = vld [vmem:[#allocation5 + $0x128] sm:$0xff]  ;;  %v330_v42 = vld [vmem:[#allocation5 + $0x1b0] sm:$0xff] }
  0x47   :  { %2228 = vmatprep.subr.bf16.mxu0 %v2652_v0  ;;  %2248 = vmatpush3.bf16.msra.mxu1 %v2247_v35  ;;  %v2292_v35 = vpack.c.bf16 %v310_v34, %v309_v33  ;;  %v331_v43 = vld [vmem:[#allocation5 + $0x1b8] sm:$0xff]  ;;  %v313_v45 = vld [vmem:[#allocation5 + $0x130] sm:$0xff]  ;;  %v332_v48 = vld [vmem:[#allocation5 + $0x1c0] sm:$0xff] }
  0x48   :  { %2249 = vmatprep.subr.bf16.mxu1 %v2652_v0  ;;  %v2745_v15 = vsub.s32 0, %v170_v13  ;;  %v314_v46 = vld [vmem:[#allocation5 + $0x138] sm:$0xff]  ;;  %v333_v49 = vld [vmem:[#allocation5 + $0x1c8] sm:$0xff] }
  0x4a   :  { %2230 = vmatpush3.bf16.msra.mxu0 %v2229_v16 }
  0x4b   :  { %2231 = vmatprep.subr.bf16.mxu0 %v2652_v0  ;;  %2251 = vmatpush3.bf16.msra.mxu1 %v2250_v38  ;;  %v2271_v38 = vpack.c.bf16 %v329_v37, %v328_v36 }
  0x4c   :  { %2252 = vmatprep.subr.bf16.mxu1 %v2652_v0 }
  0x4e   :  { %2233 = vmatpush3.bf16.msra.mxu0 %v2232_v19 }
  0x4f   :  { %2234 = vmatprep.subr.bf16.mxu0 %v2652_v0  ;;  %2254 = vmatpush3.bf16.msra.mxu1 %v2253_v41  ;;  %v2295_v41 = vpack.c.bf16 %v312_v40, %v311_v39  ;;  %v1526_v40 = vld [vmem:[#allocation7 + $0x12] ss:$0 sm:$0xff] }
  0x50   :  { %2255 = vmatprep.subr.bf16.mxu1 %v2652_v0 }
  0x52   :  { %2236 = vmatpush3.bf16.msra.mxu0 %v2235_v22 }
  0x53   :  { %2237 = vmatprep.subr.bf16.mxu0 %v2652_v0  ;;  %2257 = vmatpush3.bf16.msra.mxu1 %v2256_v44  ;;  %v2274_v44 = vpack.c.bf16 %v331_v43, %v330_v42 }
  0x54   :  { %2258 = vmatprep.subr.bf16.mxu1 %v2652_v0 }
  0x56   :  { %2239 = vmatpush3.bf16.msra.mxu0 %v2238_v25  ;;  %v2265_v25 = vpack.c.bf16 %v325_v24, %v324_v23 }
  0x57   :  { %2264 = vmatprep.subr.bf16.mxu0 %v2652_v0  ;;  %2260 = vmatpush3.bf16.msra.mxu1 %v2259_v47  ;;  %v2298_v47 = vpack.c.bf16 %v314_v46, %v313_v45  ;;  %v521_v45 = vld [vmem:[#allocation5 + $0x200] sm:$0xff]  ;;  %v522_v46 = vld [vmem:[#allocation5 + $0x208] sm:$0xff] }
  0x58   :  { %2261 = vmatprep.subr.bf16.mxu1 %v2652_v0 }
  0x59   :  { %1794 = vmatmul.mubr.f32.vlgmr.msra.gmra.mrb[0].mxu0 %v2731_v26 }
  0x5a   :  { %1863 = vmatprep.mubr.msk.f32.mxu0 %vm2653_vm0, %v2654_v1  ;;  %2266 = vmatpush3.bf16.msra.mxu0 %v2265_v25 }
  0x5b   :  { %2263 = vmatpush3.bf16.msra.mxu1 %v2262_v50  ;;  %2267 = vmatprep.subr.bf16.mxu0 %v2652_v0  ;;  %v315_v50 = vld [vmem:[#allocation5 + $0x140] sm:$0xff] }
  0x5c   :  { %2288 = vmatprep.subr.bf16.mxu1 %v2652_v0 }
  0x5e   :  { %2269 = vmatpush3.bf16.msra.mxu0 %v2268_v32 }
  0x5f   :  { %2270 = vmatprep.subr.bf16.mxu0 %v2652_v0 }
  0x62   :  { %2272 = vmatpush3.bf16.msra.mxu0 %v2271_v38 }
  0x63   :  { %2273 = vmatprep.subr.bf16.mxu0 %v2652_v0 }
  0x66   :  { %2275 = vmatpush3.bf16.msra.mxu0 %v2274_v44 }
  0x67   :  { %2276 = vmatprep.subr.bf16.mxu0 %v2652_v0 }
 0x12c   :  { %v142_v52 = vpop.f32.mrb[0].mxu0 }
 0x12d   :  { %v143_v53 = vadd.f32 %v1523_v51, %v142_v52  ;;  %v1795_v54 = vpop.f32.mrb[1].mxu0  ;;  %v2277_v51 = vpack.c.bf16 %v333_v49, %v332_v48  ;;  %v316_v52 = vld [vmem:[#allocation5 + $0x148] sm:$0xff]  ;;  %v523_v48 = vld [vmem:[#allocation5 + $0x210] sm:$0xff]  ;;  %v524_v49 = vld [vmem:[#allocation5 + $0x218] sm:$0xff] }
 0x12e   :  { %v335_v54 = vld [vmem:[#allocation5 + $0x1d8] sm:$0xff] }
 0x12f   :  { %v146_v55 = vmax.f32 %v143_v53, 0.0  ;;  %v334_v53 = vld [vmem:[#allocation5 + $0x1d0] sm:$0xff]  ;;  %2278 = vmatpush3.bf16.msra.mxu0 %v2277_v51  ;;  %v525_v51 = vld [vmem:[#allocation5 + $0x220] sm:$0xff] }
 0x130   :  { %2279 = vmatprep.subr.bf16.mxu0 %v2652_v0 }
 0x131   :  { %v147_v56 = vrot.slane %v146_v55, 4  ;;  %v153_v57 = vmul.f32 %v146_v55, %v146_v55 }
 0x133   :  { %v148_v58 = vadd.f32 %v147_v56, %v146_v55  ;;  %v154_v59 = vrot.slane %v153_v57, 4  ;;  %v317_v56 = vld [vmem:[#allocation5 + $0x150] sm:$0xff] }
 0x135   :  { %v149_v60 = vrot.slane %v148_v58, 2  ;;  %v155_v61 = vadd.f32 %v154_v59, %v153_v57  ;;  %v318_v57 = vld [vmem:[#allocation5 + $0x158] sm:$0xff] }
 0x136   :  { %v2304_v59 = vpack.c.bf16 %v318_v57, %v317_v56  ;;  %v529_v57 = vld [vmem:[#allocation5 + $0x240] sm:$0xff] }
 0x137   :  { %v150_v62 = vadd.f32 %v149_v60, %v148_v58  ;;  %v156_v63 = vrot.slane %v155_v61, 2  ;;  %v2280_v58 = vpack.c.bf16 %v335_v54, %v334_v53  ;;  %v336_v60 = vld [vmem:[#allocation5 + $0x1e0] sm:$0xff]  ;;  %v527_v54 = vld [vmem:[#allocation5 + $0x230] sm:$0xff] }
 0x139   :  { %v157_v2 = vadd.f32 %v156_v63, %v155_v61  ;;  %v151_v3 = vrot.slane %v150_v62, 1  ;;  %v337_v61 = vld [vmem:[#allocation5 + $0x1e8] sm:$0xff]  ;;  %2281 = vmatpush3.bf16.msra.mxu0 %v2280_v58 }
 0x13a   :  { %v320_v63 = vld [vmem:[#allocation5 + $0x168] sm:$0xff]  ;;  %2282 = vmatprep.subr.bf16.mxu0 %v2652_v0 }
 0x13b   :  { %v158_v4 = vrot.slane %v157_v2, 1  ;;  %v152_v5 = vadd.f32 %v151_v3, %v150_v62  ;;  %v319_v62 = vld [vmem:[#allocation5 + $0x160] sm:$0xff]  ;;  %v530_v58 = vld [vmem:[#allocation5 + $0x248] sm:$0xff] }
 0x13c   :  { %v2307_v3 = vpack.c.bf16 %v320_v63, %v319_v62  ;;  %v533_v63 = vld [vmem:[#allocation5 + $0x260] sm:$0xff] }
 0x13d   :  { %v159_v6 = vadd.f32 %v158_v4, %v157_v2  ;;  %v160_v7 = vmul.f32 0.125, %v152_v5  ;;  %v2283_v2 = vpack.c.bf16 %v337_v61, %v336_v60  ;;  %v338_v4 = vld [vmem:[#allocation5 + $0x1f0] sm:$0xff]  ;;  %v339_v5 = vld [vmem:[#allocation5 + $0x1f8] sm:$0xff] }
 0x13e   :  { %v531_v60 = vld [vmem:[#allocation5 + $0x250] sm:$0xff]  ;;  %v532_v61 = vld [vmem:[#allocation5 + $0x258] sm:$0xff] }
 0x13f   :  { %v161_v8 = vmul.f32 0.125, %v159_v6  ;;  %v162_v9 = vmul.f32 %v160_v7, %v160_v7  ;;  %v168_v18 = vsub.f32 %v146_v55, %v160_v7  ;;  %v2301_v55 = vpack.c.bf16 %v316_v52, %v315_v50  ;;  %v321_v6 = vld [vmem:[#allocation5 + $0x170] sm:$0xff]  ;;  %v322_v7 = vld [vmem:[#allocation5 + $0x178] sm:$0xff]  ;;  %2284 = vmatpush3.bf16.msra.mxu0 %v2283_v2  ;;  %v526_v52 = vld [vmem:[#allocation5 + $0x228] sm:$0xff] }
 0x140   :  { %2285 = vmatprep.subr.bf16.mxu0 %v2652_v0  ;;  %v2316_v50 = vpack.c.bf16 %v524_v49, %v523_v48  ;;  %v2319_v53 = vpack.c.bf16 %v526_v52, %v525_v51  ;;  %v2328_v62 = vpack.c.bf16 %v532_v61, %v531_v60  ;;  %v534_v2 = vld [vmem:[#allocation5 + $0x268] sm:$0xff]  ;;  %v667_v48 = vld [vmem:[#allocation5 + $0x318] sm:$0xff] }
 0x141   :  { %v163_v10 = vsub.f32 %v161_v8, %v162_v9  ;;  %v2286_v8 = vpack.c.bf16 %v339_v5, %v338_v4  ;;  %v2310_v9 = vpack.c.bf16 %v322_v7, %v321_v6  ;;  %v535_v4 = vld [vmem:[#allocation5 + $0x270] sm:$0xff]  ;;  %v536_v5 = vld [vmem:[#allocation5 + $0x278] sm:$0xff] }
 0x142   :  { %v2334_v6 = vpack.c.bf16 %v536_v5, %v535_v4  ;;  %v650_v51 = vld [vmem:[#allocation5 + $0x298] sm:$0xff]  ;;  %v673_v4 = vld [vmem:[#allocation5 + $0x348] sm:$0xff]  ;;  %v655_v5 = vld [vmem:[#allocation5 + $0x2c0] sm:$0xff] }
 0x143   :  { %v165_v11 = vadd.f32 1e-05, %v163_v10  ;;  %2287 = vmatpush3.bf16.msra.mxu0 %v2286_v8  ;;  %v1525_v10 = vld [vmem:[#allocation7 + $0x1] ss:$0 sm:$0xff]  ;;  %v1527_v8 = vld [vmem:[#allocation7 + $0x2] ss:$0 sm:$0xff] }
 0x144   :  { %2312 = vmatprep.subr.bf16.mxu0 %v2652_v0  ;;  %v671_v60 = vld [vmem:[#allocation5 + $0x338] sm:$0xff] }
 0x145   :  { %2537 = vrsqrt.f32 %v165_v11 }
 0x146   :  { %1864 = vmatmul.mubr.f32.vlgmr.msra.gmra.mrb[2].mxu0 %v2731_v26 }
 0x147   :  { %1933 = vmatprep.mubr.msk.f32.mxu0 %vm2653_vm0, %v2654_v1 }
 0x14f   :  { %v2538_v16 = vpop.eup %2537 }
 0x150   :  { %v167_v17 = vmul.f32 %v2538_v16, %v164_v14 }
 0x152   :  { %v172_v19 = vrot.slane %v167_v17, %v2745_v15 }
 0x154   :  { %v173_v21 = vmul.f32 %v172_v19, %v168_v18 }
 0x156   :  { %v179_v22 = vadd.f32 %v1524_v20, %v173_v21 }
 0x158   :  { %1829 = vmatmul.mubr.f32.vlgmr.msra.gmra.mrb[0].mxu1 %v179_v22 }
 0x159   :  { %1898 = vmatprep.mubr.msk.f32.mxu1 %vm2653_vm0, %v2654_v1  ;;  %2290 = vmatpush3.bf16.msra.mxu1 %v2289_v29 }
 0x15a   :  { %2291 = vmatprep.subr.bf16.mxu1 %v2652_v0 }
 0x15d   :  { %2293 = vmatpush3.bf16.msra.mxu1 %v2292_v35  ;;  %v290_v35 = vld [vmem:[#allocation7 + $0xa] sm:$0x1] }
 0x15e   :  { %2294 = vmatprep.subr.bf16.mxu1 %v2652_v0 }
 0x161   :  { %2296 = vmatpush3.bf16.msra.mxu1 %v2295_v41 }
 0x162   :  { %2297 = vmatprep.subr.bf16.mxu1 %v2652_v0 }
 0x165   :  { %2299 = vmatpush3.bf16.msra.mxu1 %v2298_v47  ;;  %v2313_v47 = vpack.c.bf16 %v522_v46, %v521_v45  ;;  %v648_v45 = vld [vmem:[#allocation5 + $0x288] sm:$0xff] }
 0x166   :  { %2300 = vmatprep.subr.bf16.mxu1 %v2652_v0 }
 0x167   :  { %2314 = vmatpush3.bf16.msra.mxu0 %v2313_v47  ;;  %v666_v47 = vld [vmem:[#allocation5 + $0x310] sm:$0xff] }
 0x168   :  { %2315 = vmatprep.subr.bf16.mxu0 %v2652_v0  ;;  %v2340_v49 = vpack.c.bf16 %v667_v48, %v666_v47 }
 0x169   :  { %2302 = vmatpush3.bf16.msra.mxu1 %v2301_v55  ;;  %v528_v55 = vld [vmem:[#allocation5 + $0x238] sm:$0xff] }
 0x16a   :  { %2303 = vmatprep.subr.bf16.mxu1 %v2652_v0  ;;  %v2322_v56 = vpack.c.bf16 %v528_v55, %v527_v54  ;;  %v669_v54 = vld [vmem:[#allocation5 + $0x328] sm:$0xff] }
 0x16b   :  { %2317 = vmatpush3.bf16.msra.mxu0 %v2316_v50  ;;  %v649_v50 = vld [vmem:[#allocation5 + $0x290] sm:$0xff] }
 0x16c   :  { %2318 = vmatprep.subr.bf16.mxu0 %v2652_v0  ;;  %v2364_v52 = vpack.c.bf16 %v650_v51, %v649_v50  ;;  %v630_v51 = vld [vmem:[#allocation7 + $0xc] sm:$0x1] }
 0x16d   :  { %2305 = vmatpush3.bf16.msra.mxu1 %v2304_v59  ;;  %v2325_v59 = vpack.c.bf16 %v530_v58, %v529_v57  ;;  %v652_v57 = vld [vmem:[#allocation5 + $0x2a8] sm:$0xff] }
 0x16e   :  { %2306 = vmatprep.subr.bf16.mxu1 %v2652_v0 }
 0x16f   :  { %2320 = vmatpush3.bf16.msra.mxu0 %v2319_v53  ;;  %v668_v53 = vld [vmem:[#allocation5 + $0x320] sm:$0xff] }
 0x170   :  { %2321 = vmatprep.subr.bf16.mxu0 %v2652_v0  ;;  %v2343_v55 = vpack.c.bf16 %v669_v54, %v668_v53 }
 0x171   :  { %2308 = vmatpush3.bf16.msra.mxu1 %v2307_v3  ;;  %v2331_v3 = vpack.c.bf16 %v534_v2, %v533_v63  ;;  %v654_v63 = vld [vmem:[#allocation5 + $0x2b8] sm:$0xff] }
 0x172   :  { %2309 = vmatprep.subr.bf16.mxu1 %v2652_v0 }
 0x173   :  { %2323 = vmatpush3.bf16.msra.mxu0 %v2322_v56  ;;  %v651_v56 = vld [vmem:[#allocation5 + $0x2a0] sm:$0xff] }
 0x174   :  { %2324 = vmatprep.subr.bf16.mxu0 %v2652_v0  ;;  %v2367_v58 = vpack.c.bf16 %v652_v57, %v651_v56  ;;  %v1530_v56 = vld [vmem:[#allocation7 + $0x14] ss:$0 sm:$0xff] }
 0x175   :  { %2311 = vmatpush3.bf16.msra.mxu1 %v2310_v9 }
 0x176   :  { %2336 = vmatprep.subr.bf16.mxu1 %v2652_v0 }
 0x177   :  { %2326 = vmatpush3.bf16.msra.mxu0 %v2325_v59  ;;  %v670_v59 = vld [vmem:[#allocation5 + $0x330] sm:$0xff] }
 0x178   :  { %2327 = vmatprep.subr.bf16.mxu0 %v2652_v0  ;;  %v2346_v61 = vpack.c.bf16 %v671_v60, %v670_v59 }
 0x17b   :  { %2329 = vmatpush3.bf16.msra.mxu0 %v2328_v62  ;;  %v653_v62 = vld [vmem:[#allocation5 + $0x2b0] sm:$0xff] }
 0x17c   :  { %2330 = vmatprep.subr.bf16.mxu0 %v2652_v0  ;;  %v2370_v2 = vpack.c.bf16 %v654_v63, %v653_v62  ;;  %v862_v62 = vld [vmem:[#allocation5 + $0x388] sm:$0xff] }
 0x17f   :  { %2332 = vmatpush3.bf16.msra.mxu0 %v2331_v3  ;;  %v672_v3 = vld [vmem:[#allocation5 + $0x340] sm:$0xff] }
 0x180   :  { %2333 = vmatprep.subr.bf16.mxu0 %v2652_v0 }
 0x183   :  { %2335 = vmatpush3.bf16.msra.mxu0 %v2334_v6  ;;  %v2349_v6 = vpack.c.bf16 %v673_v4, %v672_v3  ;;  %v864_v3 = vld [vmem:[#allocation5 + $0x398] sm:$0xff] }
 0x184   :  { %2360 = vmatprep.subr.bf16.mxu0 %v2652_v0 }
 0x219   :  { %v406_v43 = vpop.f32.mrb[2].mxu0 }
 0x21a   :  { %v1865_v44 = vpop.f32.mrb[3].mxu0 }
 0x21b   :  { %v647_v44 = vld [vmem:[#allocation5 + $0x280] sm:$0xff] }
 0x21c   :  { %v2361_v46 = vpack.c.bf16 %v648_v45, %v647_v44 }
 0x22b   :  { %v268_v11 = vpop.f32.mrb[0].mxu1 }
 0x22c   :  { %v269_v12 = vadd.f32 %v1525_v10, %v268_v11  ;;  %v1830_v13 = vpop.f32.mrb[1].mxu1 }
 0x22e   :  { %v272_v14 = vmax.f32 %v269_v12, 0.0 }
 0x230   :  { %v273_v16 = vrot.slane %v272_v14, 4  ;;  %v279_v17 = vmul.f32 %v272_v14, %v272_v14 }
 0x232   :  { %v274_v18 = vadd.f32 %v273_v16, %v272_v14  ;;  %v280_v19 = vrot.slane %v279_v17, 4 }
 0x234   :  { %v275_v20 = vrot.slane %v274_v18, 2  ;;  %v281_v21 = vadd.f32 %v280_v19, %v279_v17 }
 0x236   :  { %v276_v22 = vadd.f32 %v275_v20, %v274_v18  ;;  %v282_v23 = vrot.slane %v281_v21, 2 }
 0x238   :  { %v277_v24 = vrot.slane %v276_v22, 1  ;;  %v283_v25 = vadd.f32 %v282_v23, %v281_v21 }
 0x23a   :  { %v278_v27 = vadd.f32 %v277_v24, %v276_v22  ;;  %v284_v28 = vrot.slane %v283_v25, 1 }
 0x23c   :  { %v285_v29 = vadd.f32 %v284_v28, %v283_v25  ;;  %v286_v30 = vmul.f32 0.125, %v278_v27 }
 0x23e   :  { %v287_v31 = vmul.f32 0.125, %v285_v29  ;;  %v288_v32 = vmul.f32 %v286_v30, %v286_v30  ;;  %v294_v38 = vsub.f32 %v272_v14, %v286_v30 }
 0x240   :  { %v289_v33 = vsub.f32 %v287_v31, %v288_v32 }
 0x242   :  { %v291_v34 = vadd.f32 1e-05, %v289_v33  ;;  %v504_v33 = vld [vmem:[#allocation7 + $0xb] sm:$0x1] }
 0x244   :  { %2539 = vrsqrt.f32 %v291_v34 }
 0x24e   :  { %v2540_v36 = vpop.eup %2539 }
 0x24f   :  { %v293_v37 = vmul.f32 %v2540_v36, %v290_v35 }
 0x251   :  { %v298_v39 = vrot.slane %v293_v37, %v2745_v15 }
 0x253   :  { %v299_v41 = vmul.f32 %v298_v39, %v294_v38  ;;  %v1528_v38 = vld [vmem:[#allocation7 + $0x13] ss:$0 sm:$0xff] }
 0x255   :  { %v305_v42 = vadd.f32 %v1526_v40, %v299_v41  ;;  %v664_v41 = vld [vmem:[#allocation5 + $0x300] sm:$0xff] }
 0x257   :  { %1899 = vmatmul.mubr.f32.vlgmr.msra.gmra.mrb[2].mxu1 %v305_v42  ;;  %v665_v42 = vld [vmem:[#allocation5 + $0x308] sm:$0xff] }
 0x258   :  { %1968 = vmatprep.mubr.msk.f32.mxu1 %vm2653_vm0, %v2654_v1 }
 0x32a   :  { %v476_v7 = vpop.f32.mrb[2].mxu1 }
 0x32b   :  { %v477_v9 = vadd.f32 %v476_v7, %v406_v43  ;;  %v1900_v10 = vpop.f32.mrb[3].mxu1  ;;  %v2337_v43 = vpack.c.bf16 %v665_v42, %v664_v41  ;;  %v656_v7 = vld [vmem:[#allocation5 + $0x2c8] sm:$0xff] }
 0x32c   :  { %v2373_v10 = vpack.c.bf16 %v656_v7, %v655_v5  ;;  %v865_v5 = vld [vmem:[#allocation5 + $0x3a0] sm:$0xff] }
 0x32d   :  { %v485_v11 = vadd.f32 %v1527_v8, %v477_v9  ;;  %2338 = vmatpush3.bf16.msra.mxu1 %v2337_v43  ;;  %v674_v8 = vld [vmem:[#allocation5 + $0x350] sm:$0xff]  ;;  %v675_v9 = vld [vmem:[#allocation5 + $0x358] sm:$0xff] }
 0x32e   :  { %2339 = vmatprep.subr.bf16.mxu1 %v2652_v0 }
 0x32f   :  { %v486_v12 = vmax.f32 %v485_v11, 0.0  ;;  %v657_v11 = vld [vmem:[#allocation5 + $0x2d0] sm:$0xff] }
 0x331   :  { %v487_v13 = vrot.slane %v486_v12, 4  ;;  %v493_v14 = vmul.f32 %v486_v12, %v486_v12  ;;  %2341 = vmatpush3.bf16.msra.mxu1 %v2340_v49 }
 0x332   :  { %2342 = vmatprep.subr.bf16.mxu1 %v2652_v0 }
 0x333   :  { %v488_v16 = vadd.f32 %v487_v13, %v486_v12  ;;  %v494_v17 = vrot.slane %v493_v14, 4  ;;  %v2352_v13 = vpack.c.bf16 %v675_v9, %v674_v8  ;;  %v867_v8 = vld [vmem:[#allocation5 + $0x3b0] sm:$0xff]  ;;  %v868_v9 = vld [vmem:[#allocation5 + $0x3b8] sm:$0xff] }
 0x335   :  { %v489_v18 = vrot.slane %v488_v16, 2  ;;  %v495_v19 = vadd.f32 %v494_v17, %v493_v14  ;;  %2344 = vmatpush3.bf16.msra.mxu1 %v2343_v55  ;;  %v677_v17 = vld [vmem:[#allocation5 + $0x368] sm:$0xff] }
 0x336   :  { %2345 = vmatprep.subr.bf16.mxu1 %v2652_v0 }
 0x337   :  { %v490_v20 = vadd.f32 %v489_v18, %v488_v16  ;;  %v496_v21 = vrot.slane %v495_v19, 2  ;;  %v676_v16 = vld [vmem:[#allocation5 + $0x360] sm:$0xff] }
 0x338   :  { %v659_v18 = vld [vmem:[#allocation5 + $0x2e0] sm:$0xff] }
 0x339   :  { %v491_v22 = vrot.slane %v490_v20, 1  ;;  %v497_v23 = vadd.f32 %v496_v21, %v495_v19  ;;  %2347 = vmatpush3.bf16.msra.mxu1 %v2346_v61  ;;  %v660_v19 = vld [vmem:[#allocation5 + $0x2e8] sm:$0xff]  ;;  %v861_v61 = vld [vmem:[#allocation5 + $0x380] sm:$0xff] }
 0x33a   :  { %2348 = vmatprep.subr.bf16.mxu1 %v2652_v0  ;;  %v2379_v21 = vpack.c.bf16 %v660_v19, %v659_v18  ;;  %v2385_v63 = vpack.c.bf16 %v862_v62, %v861_v61  ;;  %v873_v18 = vld [vmem:[#allocation5 + $0x3e0] sm:$0xff]  ;;  %v874_v19 = vld [vmem:[#allocation5 + $0x3e8] sm:$0xff]  ;;  %v1006_v62 = vld [vmem:[#allocation5 + $0x490] sm:$0xff] }
 0x33b   :  { %v492_v24 = vadd.f32 %v491_v22, %v490_v20  ;;  %v498_v25 = vrot.slane %v497_v23, 1  ;;  %v2355_v20 = vpack.c.bf16 %v677_v17, %v676_v16  ;;  %v678_v22 = vld [vmem:[#allocation5 + $0x370] sm:$0xff]  ;;  %v872_v16 = vld [vmem:[#allocation5 + $0x3d8] sm:$0xff] }
 0x33d   :  { %v499_v27 = vadd.f32 %v498_v25, %v497_v23  ;;  %v500_v28 = vmul.f32 0.125, %v492_v24  ;;  %2350 = vmatpush3.bf16.msra.mxu1 %v2349_v6  ;;  %v679_v23 = vld [vmem:[#allocation5 + $0x378] sm:$0xff]  ;;  %v661_v24 = vld [vmem:[#allocation5 + $0x2f0] sm:$0xff]  ;;  %v866_v6 = vld [vmem:[#allocation5 + $0x3a8] sm:$0xff] }
 0x33e   :  { %2351 = vmatprep.subr.bf16.mxu1 %v2652_v0  ;;  %v662_v25 = vld [vmem:[#allocation5 + $0x2f8] sm:$0xff]  ;;  %v2391_v7 = vpack.c.bf16 %v866_v6, %v865_v5  ;;  %v1008_v6 = vld [vmem:[#allocation5 + $0x4a0] sm:$0xff] }
 0x33f   :  { %v501_v29 = vmul.f32 0.125, %v499_v27  ;;  %v502_v30 = vmul.f32 %v500_v28, %v500_v28  ;;  %v508_v36 = vsub.f32 %v486_v12, %v500_v28  ;;  %v658_v12 = vld [vmem:[#allocation5 + $0x2d8] sm:$0xff]  ;;  %v2358_v27 = vpack.c.bf16 %v679_v23, %v678_v22 }
 0x340   :  { %v2376_v14 = vpack.c.bf16 %v658_v12, %v657_v11  ;;  %v2382_v28 = vpack.c.bf16 %v662_v25, %v661_v24  ;;  %v869_v11 = vld [vmem:[#allocation5 + $0x3c0] sm:$0xff]  ;;  %v870_v12 = vld [vmem:[#allocation5 + $0x3c8] sm:$0xff]  ;;  %v876_v22 = vld [vmem:[#allocation5 + $0x3f8] sm:$0xff] }
 0x341   :  { %v503_v31 = vsub.f32 %v501_v29, %v502_v30  ;;  %2353 = vmatpush3.bf16.msra.mxu1 %v2352_v13  ;;  %v1529_v29 = vld [vmem:[#allocation7 + $0x3] ss:$0 sm:$0xff]  ;;  %v2397_v13 = vpack.c.bf16 %v870_v12, %v869_v11  ;;  %v1531_v25 = vld [vmem:[#allocation7 + $0x4] ss:$0 sm:$0xff]  ;;  %v1010_v12 = vld [vmem:[#allocation5 + $0x4b0] sm:$0xff] }
 0x342   :  { %2354 = vmatprep.subr.bf16.mxu1 %v2652_v0 }
 0x343   :  { %v505_v32 = vadd.f32 1e-05, %v503_v31 }
 0x345   :  { %2541 = vrsqrt.f32 %v505_v32  ;;  %2356 = vmatpush3.bf16.msra.mxu1 %v2355_v20  ;;  %v2403_v20 = vpack.c.bf16 %v874_v19, %v873_v18  ;;  %v1012_v19 = vld [vmem:[#allocation5 + $0x4c0] sm:$0xff] }
 0x346   :  { %2357 = vmatprep.subr.bf16.mxu1 %v2652_v0 }
 0x349   :  { %2359 = vmatpush3.bf16.msra.mxu1 %v2358_v27 }
 0x34a   :  { %2384 = vmatprep.subr.bf16.mxu1 %v2652_v0 }
 0x34c   :  { %1969 = vmatmul.mubr.f32.vlgmr.msra.gmra.mrb[4].mxu1 %v2731_v26 }
 0x34d   :  { %2038 = vmatprep.mubr.msk.f32.mxu1 %vm2653_vm0, %v2654_v1  ;;  %2386 = vmatpush3.bf16.msra.mxu1 %v2385_v63  ;;  %v1007_v63 = vld [vmem:[#allocation5 + $0x498] sm:$0xff] }
 0x34e   :  { %2387 = vmatprep.subr.bf16.mxu1 %v2652_v0 }
 0x34f   :  { %v2542_v34 = vpop.eup %2541 }
 0x350   :  { %v507_v35 = vmul.f32 %v2542_v34, %v504_v33 }
 0x352   :  { %v512_v37 = vrot.slane %v507_v35, %v2745_v15 }
 0x354   :  { %v513_v39 = vmul.f32 %v512_v37, %v508_v36 }
 0x356   :  { %v519_v40 = vadd.f32 %v1528_v38, %v513_v39 }
 0x358   :  { %1934 = vmatmul.mubr.f32.vlgmr.msra.gmra.mrb[4].mxu0 %v519_v40 }
 0x359   :  { %2003 = vmatprep.mubr.msk.f32.mxu0 %vm2653_vm0, %v2654_v1  ;;  %2362 = vmatpush3.bf16.msra.mxu0 %v2361_v46 }
 0x35a   :  { %2363 = vmatprep.subr.bf16.mxu0 %v2652_v0 }
 0x35d   :  { %2365 = vmatpush3.bf16.msra.mxu0 %v2364_v52 }
 0x35e   :  { %2366 = vmatprep.subr.bf16.mxu0 %v2652_v0 }
 0x361   :  { %2368 = vmatpush3.bf16.msra.mxu0 %v2367_v58 }
 0x362   :  { %2369 = vmatprep.subr.bf16.mxu0 %v2652_v0 }
 0x365   :  { %2371 = vmatpush3.bf16.msra.mxu0 %v2370_v2  ;;  %v863_v2 = vld [vmem:[#allocation5 + $0x390] sm:$0xff] }
 0x366   :  { %2372 = vmatprep.subr.bf16.mxu0 %v2652_v0  ;;  %v2388_v4 = vpack.c.bf16 %v864_v3, %v863_v2  ;;  %v2412_v2 = vpack.c.bf16 %v1007_v63, %v1006_v62  ;;  %v989_v3 = vld [vmem:[#allocation5 + $0x410] sm:$0xff] }
 0x368   :  { %2389 = vmatpush3.bf16.msra.mxu1 %v2388_v4  ;;  %v990_v4 = vld [vmem:[#allocation5 + $0x418] sm:$0xff] }
 0x369   :  { %2374 = vmatpush3.bf16.msra.mxu0 %v2373_v10  ;;  %2390 = vmatprep.subr.bf16.mxu1 %v2652_v0  ;;  %v2394_v10 = vpack.c.bf16 %v868_v9, %v867_v8  ;;  %v2436_v5 = vpack.c.bf16 %v990_v4, %v989_v3  ;;  %v991_v9 = vld [vmem:[#allocation5 + $0x420] sm:$0xff]  ;;  %v970_v4 = vld [vmem:[#allocation7 + $0xe] sm:$0x1] }
 0x36a   :  { %2375 = vmatprep.subr.bf16.mxu0 %v2652_v0 }
 0x36c   :  { %2392 = vmatpush3.bf16.msra.mxu1 %v2391_v7  ;;  %v1009_v7 = vld [vmem:[#allocation5 + $0x4a8] sm:$0xff] }
 0x36d   :  { %2377 = vmatpush3.bf16.msra.mxu0 %v2376_v14  ;;  %2393 = vmatprep.subr.bf16.mxu1 %v2652_v0  ;;  %v871_v14 = vld [vmem:[#allocation5 + $0x3d0] sm:$0xff]  ;;  %v2415_v8 = vpack.c.bf16 %v1009_v7, %v1008_v6 }
 0x36e   :  { %2378 = vmatprep.subr.bf16.mxu0 %v2652_v0  ;;  %v2400_v17 = vpack.c.bf16 %v872_v16, %v871_v14  ;;  %v993_v16 = vld [vmem:[#allocation5 + $0x430] sm:$0xff] }
 0x370   :  { %2395 = vmatpush3.bf16.msra.mxu1 %v2394_v10  ;;  %v992_v10 = vld [vmem:[#allocation5 + $0x428] sm:$0xff] }
 0x371   :  { %2380 = vmatpush3.bf16.msra.mxu0 %v2379_v21  ;;  %2396 = vmatprep.subr.bf16.mxu1 %v2652_v0  ;;  %v875_v21 = vld [vmem:[#allocation5 + $0x3f0] sm:$0xff]  ;;  %v2439_v11 = vpack.c.bf16 %v992_v10, %v991_v9  ;;  %v1218_v9 = vld [vmem:[#allocation5 + $0x580] sm:$0xff]  ;;  %v1219_v10 = vld [vmem:[#allocation5 + $0x588] sm:$0xff] }
 0x372   :  { %2381 = vmatprep.subr.bf16.mxu0 %v2652_v0  ;;  %v2406_v23 = vpack.c.bf16 %v876_v22, %v875_v21  ;;  %v995_v21 = vld [vmem:[#allocation5 + $0x440] sm:$0xff] }
 0x374   :  { %2398 = vmatpush3.bf16.msra.mxu1 %v2397_v13  ;;  %v1011_v13 = vld [vmem:[#allocation5 + $0x4b8] sm:$0xff] }
 0x375   :  { %2383 = vmatpush3.bf16.msra.mxu0 %v2382_v28  ;;  %2399 = vmatprep.subr.bf16.mxu1 %v2652_v0  ;;  %v2418_v14 = vpack.c.bf16 %v1011_v13, %v1010_v12  ;;  %v2457_v13 = vpack.c.bf16 %v1219_v10, %v1218_v9 }
 0x376   :  { %2408 = vmatprep.subr.bf16.mxu0 %v2652_v0 }
 0x378   :  { %2401 = vmatpush3.bf16.msra.mxu1 %v2400_v17  ;;  %v994_v17 = vld [vmem:[#allocation5 + $0x438] sm:$0xff] }
 0x379   :  { %2402 = vmatprep.subr.bf16.mxu1 %v2652_v0  ;;  %v2442_v18 = vpack.c.bf16 %v994_v17, %v993_v16  ;;  %v1220_v16 = vld [vmem:[#allocation5 + $0x590] sm:$0xff]  ;;  %v1221_v17 = vld [vmem:[#allocation5 + $0x598] sm:$0xff] }
 0x37c   :  { %2404 = vmatpush3.bf16.msra.mxu1 %v2403_v20  ;;  %v1013_v20 = vld [vmem:[#allocation5 + $0x4c8] sm:$0xff] }
 0x37d   :  { %2405 = vmatprep.subr.bf16.mxu1 %v2652_v0  ;;  %v2421_v22 = vpack.c.bf16 %v1013_v20, %v1012_v19  ;;  %v1222_v19 = vld [vmem:[#allocation5 + $0x5a0] sm:$0xff]  ;;  %v1223_v20 = vld [vmem:[#allocation5 + $0x5a8] sm:$0xff] }
 0x380   :  { %2407 = vmatpush3.bf16.msra.mxu1 %v2406_v23  ;;  %v996_v23 = vld [vmem:[#allocation5 + $0x448] sm:$0xff] }
 0x381   :  { %2432 = vmatprep.subr.bf16.mxu1 %v2652_v0 }
 0x41f   :  { %v746_v59 = vpop.f32.mrb[4].mxu1 }
 0x420   :  { %v1970_v60 = vpop.f32.mrb[5].mxu1 }
 0x421   :  { %v988_v60 = vld [vmem:[#allocation5 + $0x408] sm:$0xff] }
 0x42b   :  { %v608_v30 = vpop.f32.mrb[4].mxu0 }
 0x42c   :  { %v609_v31 = vadd.f32 %v1529_v29, %v608_v30  ;;  %v1935_v32 = vpop.f32.mrb[5].mxu0 }
 0x42e   :  { %v612_v33 = vmax.f32 %v609_v31, 0.0 }
 0x430   :  { %v613_v34 = vrot.slane %v612_v33, 4  ;;  %v619_v35 = vmul.f32 %v612_v33, %v612_v33 }
 0x432   :  { %v614_v36 = vadd.f32 %v613_v34, %v612_v33  ;;  %v620_v37 = vrot.slane %v619_v35, 4 }
 0x434   :  { %v615_v38 = vrot.slane %v614_v36, 2  ;;  %v621_v39 = vadd.f32 %v620_v37, %v619_v35 }
 0x436   :  { %v616_v40 = vadd.f32 %v615_v38, %v614_v36  ;;  %v622_v41 = vrot.slane %v621_v39, 2 }
 0x438   :  { %v617_v42 = vrot.slane %v616_v40, 1  ;;  %v623_v43 = vadd.f32 %v622_v41, %v621_v39 }
 0x43a   :  { %v618_v44 = vadd.f32 %v617_v42, %v616_v40  ;;  %v624_v26 = vrot.slane %v623_v43, 1 }
 0x43c   :  { %v625_v45 = vadd.f32 %v624_v26, %v623_v43  ;;  %v626_v46 = vmul.f32 0.125, %v618_v44 }
 0x43e   :  { %v627_v47 = vmul.f32 0.125, %v625_v45  ;;  %v628_v48 = vmul.f32 %v626_v46, %v626_v46  ;;  %v634_v54 = vsub.f32 %v612_v33, %v626_v46 }
 0x440   :  { %v629_v49 = vsub.f32 %v627_v47, %v628_v48  ;;  %v844_v48 = vld [vmem:[#allocation7 + $0xd] sm:$0x1] }
 0x442   :  { %v631_v50 = vadd.f32 1e-05, %v629_v49 }
 0x444   :  { %2543 = vrsqrt.f32 %v631_v50 }
 0x44e   :  { %v2544_v52 = vpop.eup %2543 }
 0x44f   :  { %v633_v53 = vmul.f32 %v2544_v52, %v630_v51 }
 0x451   :  { %v638_v55 = vrot.slane %v633_v53, %v2745_v15  ;;  %v1532_v53 = vld [vmem:[#allocation7 + $0x15] ss:$0 sm:$0xff] }
 0x453   :  { %v639_v57 = vmul.f32 %v638_v55, %v634_v54 }
 0x455   :  { %v645_v58 = vadd.f32 %v1530_v56, %v639_v57  ;;  %v1004_v56 = vld [vmem:[#allocation5 + $0x480] sm:$0xff]  ;;  %v1005_v57 = vld [vmem:[#allocation5 + $0x488] sm:$0xff] }
 0x457   :  { %2004 = vmatmul.mubr.f32.vlgmr.msra.gmra.mrb[6].mxu0 %v645_v58  ;;  %v2409_v58 = vpack.c.bf16 %v1005_v57, %v1004_v56 }
 0x458   :  { %2073 = vmatprep.mubr.msk.f32.mxu0 %vm2653_vm0, %v2654_v1 }
 0x459   :  { %2410 = vmatpush3.bf16.msra.mxu0 %v2409_v58 }
 0x45a   :  { %2411 = vmatprep.subr.bf16.mxu0 %v2652_v0 }
 0x45d   :  { %2413 = vmatpush3.bf16.msra.mxu0 %v2412_v2 }
 0x45e   :  { %2414 = vmatprep.subr.bf16.mxu0 %v2652_v0 }
 0x461   :  { %2416 = vmatpush3.bf16.msra.mxu0 %v2415_v8 }
 0x462   :  { %2417 = vmatprep.subr.bf16.mxu0 %v2652_v0 }
 0x465   :  { %2419 = vmatpush3.bf16.msra.mxu0 %v2418_v14 }
 0x466   :  { %2420 = vmatprep.subr.bf16.mxu0 %v2652_v0 }
 0x469   :  { %2422 = vmatpush3.bf16.msra.mxu0 %v2421_v22  ;;  %v1224_v22 = vld [vmem:[#allocation5 + $0x5b0] sm:$0xff] }
 0x46a   :  { %2423 = vmatprep.subr.bf16.mxu0 %v2652_v0 }
 0x52a   :  { %v816_v24 = vpop.f32.mrb[6].mxu0 }
 0x52b   :  { %v817_v27 = vadd.f32 %v816_v24, %v746_v59  ;;  %v2005_v28 = vpop.f32.mrb[7].mxu0  ;;  %v987_v59 = vld [vmem:[#allocation5 + $0x400] sm:$0xff]  ;;  %v1014_v24 = vld [vmem:[#allocation5 + $0x4d0] sm:$0xff] }
 0x52c   :  { %v2433_v61 = vpack.c.bf16 %v988_v60, %v987_v59  ;;  %v997_v28 = vld [vmem:[#allocation5 + $0x450] sm:$0xff] }
 0x52d   :  { %v825_v29 = vadd.f32 %v1531_v25, %v817_v27  ;;  %v1015_v25 = vld [vmem:[#allocation5 + $0x4d8] sm:$0xff]  ;;  %v2445_v27 = vpack.c.bf16 %v996_v23, %v995_v21  ;;  %v2463_v21 = vpack.c.bf16 %v1223_v20, %v1222_v19 }
 0x52e   :  { %v1225_v23 = vld [vmem:[#allocation5 + $0x5b8] sm:$0xff] }
 0x52f   :  { %v826_v30 = vmax.f32 %v825_v29, 0.0  ;;  %v998_v29 = vld [vmem:[#allocation5 + $0x458] sm:$0xff] }
 0x531   :  { %v827_v31 = vrot.slane %v826_v30, 4  ;;  %v833_v32 = vmul.f32 %v826_v30, %v826_v30 }
 0x533   :  { %v828_v33 = vadd.f32 %v827_v31, %v826_v30  ;;  %v834_v34 = vrot.slane %v833_v32, 4  ;;  %v2448_v31 = vpack.c.bf16 %v998_v29, %v997_v28  ;;  %v1228_v29 = vld [vmem:[#allocation5 + $0x5d0] sm:$0xff] }
 0x535   :  { %v829_v35 = vrot.slane %v828_v33, 2  ;;  %v835_v36 = vadd.f32 %v834_v34, %v833_v32  ;;  %v1016_v32 = vld [vmem:[#allocation5 + $0x4e0] sm:$0xff] }
 0x536   :  { %v999_v34 = vld [vmem:[#allocation5 + $0x460] sm:$0xff] }
 0x537   :  { %v830_v37 = vadd.f32 %v829_v35, %v828_v33  ;;  %v836_v38 = vrot.slane %v835_v36, 2  ;;  %v1017_v33 = vld [vmem:[#allocation5 + $0x4e8] sm:$0xff] }
 0x538   :  { %v1000_v35 = vld [vmem:[#allocation5 + $0x468] sm:$0xff] }
 0x539   :  { %v831_v39 = vrot.slane %v830_v37, 1  ;;  %v837_v40 = vadd.f32 %v836_v38, %v835_v36  ;;  %v2427_v36 = vpack.c.bf16 %v1017_v33, %v1016_v32  ;;  %v1018_v38 = vld [vmem:[#allocation5 + $0x4f0] sm:$0xff]  ;;  %v1230_v32 = vld [vmem:[#allocation5 + $0x5e0] sm:$0xff]  ;;  %v1231_v33 = vld [vmem:[#allocation5 + $0x5e8] sm:$0xff] }
 0x53b   :  { %v832_v41 = vadd.f32 %v831_v39, %v830_v37  ;;  %v838_v42 = vrot.slane %v837_v40, 1  ;;  %v2451_v37 = vpack.c.bf16 %v1000_v35, %v999_v34  ;;  %v1019_v39 = vld [vmem:[#allocation5 + $0x4f8] sm:$0xff]  ;;  %v2475_v34 = vpack.c.bf16 %v1231_v33, %v1230_v32  ;;  %v1232_v35 = vld [vmem:[#allocation5 + $0x5f0] sm:$0xff] }
 0x53c   :  { %v1536_v33 = vld [vmem:[#allocation7 + $0x17] ss:$0 sm:$0xff] }
 0x53d   :  { %v839_v43 = vadd.f32 %v838_v42, %v837_v40  ;;  %v840_v44 = vmul.f32 0.125, %v832_v41  ;;  %v1001_v40 = vld [vmem:[#allocation5 + $0x470] sm:$0xff]  ;;  %v1002_v41 = vld [vmem:[#allocation5 + $0x478] sm:$0xff]  ;;  %v2430_v42 = vpack.c.bf16 %v1019_v39, %v1018_v38  ;;  %v1201_v38 = vld [vmem:[#allocation5 + $0x500] sm:$0xff] }
 0x53e   :  { %v1202_v39 = vld [vmem:[#allocation5 + $0x508] sm:$0xff] }
 0x53f   :  { %v841_v26 = vmul.f32 0.125, %v839_v43  ;;  %v842_v45 = vmul.f32 %v840_v44, %v840_v44  ;;  %v848_v51 = vsub.f32 %v826_v30, %v840_v44  ;;  %v2424_v30 = vpack.c.bf16 %v1015_v25, %v1014_v24  ;;  %v1533_v44 = vld [vmem:[#allocation7 + $0x5] ss:$0 sm:$0xff] }
 0x540   :  { %v2454_v43 = vpack.c.bf16 %v1002_v41, %v1001_v40  ;;  %v2466_v24 = vpack.c.bf16 %v1225_v23, %v1224_v22  ;;  %v1226_v25 = vld [vmem:[#allocation5 + $0x5c0] sm:$0xff]  ;;  %v2481_v40 = vpack.c.bf16 %v1202_v39, %v1201_v38  ;;  %v1203_v41 = vld [vmem:[#allocation5 + $0x510] sm:$0xff] }
 0x541   :  { %v843_v46 = vsub.f32 %v841_v26, %v842_v45  ;;  %2425 = vmatpush3.bf16.msra.mxu0 %v2424_v30  ;;  %v1229_v30 = vld [vmem:[#allocation5 + $0x5d8] sm:$0xff]  ;;  %v1417_v39 = vld [vmem:[#allocation5 + $0x610] sm:$0xff] }
 0x542   :  { %2426 = vmatprep.subr.bf16.mxu0 %v2652_v0 }
 0x543   :  { %v845_v47 = vadd.f32 1e-05, %v843_v46 }
 0x545   :  { %2545 = vrsqrt.f32 %v845_v47  ;;  %2428 = vmatpush3.bf16.msra.mxu0 %v2427_v36  ;;  %v1233_v36 = vld [vmem:[#allocation5 + $0x5f8] sm:$0xff] }
 0x546   :  { %2429 = vmatprep.subr.bf16.mxu0 %v2652_v0 }
 0x549   :  { %2431 = vmatpush3.bf16.msra.mxu0 %v2430_v42  ;;  %v1204_v42 = vld [vmem:[#allocation5 + $0x518] sm:$0xff] }
 0x54a   :  { %2456 = vmatprep.subr.bf16.mxu0 %v2652_v0 }
 0x54f   :  { %v2546_v49 = vpop.eup %2545 }
 0x550   :  { %v847_v50 = vmul.f32 %v2546_v49, %v844_v48 }
 0x552   :  { %v852_v52 = vrot.slane %v847_v50, %v2745_v15 }
 0x554   :  { %v853_v54 = vmul.f32 %v852_v52, %v848_v51 }
 0x556   :  { %v859_v55 = vadd.f32 %v1532_v53, %v853_v54 }
 0x558   :  { %2039 = vmatmul.mubr.f32.vlgmr.msra.gmra.mrb[6].mxu1 %v859_v55 }
 0x559   :  { %2108 = vmatprep.mubr.msk.f32.mxu1 %vm2653_vm0, %v2654_v1  ;;  %2434 = vmatpush3.bf16.msra.mxu1 %v2433_v61 }
 0x55a   :  { %2435 = vmatprep.subr.bf16.mxu1 %v2652_v0 }
 0x55d   :  { %2437 = vmatpush3.bf16.msra.mxu1 %v2436_v5 }
 0x55e   :  { %2438 = vmatprep.subr.bf16.mxu1 %v2652_v0 }
 0x561   :  { %2440 = vmatpush3.bf16.msra.mxu1 %v2439_v11  ;;  %v1534_v11 = vld [vmem:[#allocation7 + $0x16] ss:$0 sm:$0xff] }
 0x562   :  { %2441 = vmatprep.subr.bf16.mxu1 %v2652_v0 }
 0x565   :  { %2443 = vmatpush3.bf16.msra.mxu1 %v2442_v18  ;;  %v2460_v18 = vpack.c.bf16 %v1221_v17, %v1220_v16 }
 0x566   :  { %2444 = vmatprep.subr.bf16.mxu1 %v2652_v0 }
 0x569   :  { %2446 = vmatpush3.bf16.msra.mxu1 %v2445_v27  ;;  %v1227_v27 = vld [vmem:[#allocation5 + $0x5c8] sm:$0xff] }
 0x56a   :  { %2447 = vmatprep.subr.bf16.mxu1 %v2652_v0  ;;  %v2469_v28 = vpack.c.bf16 %v1227_v27, %v1226_v25 }
 0x56d   :  { %2449 = vmatpush3.bf16.msra.mxu1 %v2448_v31  ;;  %v2472_v31 = vpack.c.bf16 %v1229_v30, %v1228_v29 }
 0x56e   :  { %2450 = vmatprep.subr.bf16.mxu1 %v2652_v0 }
 0x571   :  { %2452 = vmatpush3.bf16.msra.mxu1 %v2451_v37  ;;  %v2478_v37 = vpack.c.bf16 %v1233_v36, %v1232_v35  ;;  %v1415_v36 = vld [vmem:[#allocation5 + $0x600] sm:$0xff] }
 0x572   :  { %2453 = vmatprep.subr.bf16.mxu1 %v2652_v0 }
 0x575   :  { %2455 = vmatpush3.bf16.msra.mxu1 %v2454_v43  ;;  %v2484_v43 = vpack.c.bf16 %v1204_v42, %v1203_v41  ;;  %v1419_v42 = vld [vmem:[#allocation5 + $0x620] sm:$0xff] }
 0x576   :  { %2480 = vmatprep.subr.bf16.mxu1 %v2652_v0 }
 0x62b   :  { %v948_v26 = vpop.f32.mrb[6].mxu1 }
 0x62c   :  { %v949_v45 = vadd.f32 %v1533_v44, %v948_v26  ;;  %v2040_v46 = vpop.f32.mrb[7].mxu1  ;;  %v1205_v44 = vld [vmem:[#allocation5 + $0x520] sm:$0xff]  ;;  %v1206_v26 = vld [vmem:[#allocation5 + $0x528] sm:$0xff] }
 0x62d   :  { %v1207_v46 = vld [vmem:[#allocation5 + $0x530] sm:$0xff] }
 0x62e   :  { %v952_v47 = vmax.f32 %v949_v45, 0.0  ;;  %v2487_v45 = vpack.c.bf16 %v1206_v26, %v1205_v44  ;;  %v1421_v26 = vld [vmem:[#allocation5 + $0x630] sm:$0xff] }
 0x630   :  { %v953_v48 = vrot.slane %v952_v47, 4  ;;  %v959_v49 = vmul.f32 %v952_v47, %v952_v47 }
 0x632   :  { %v954_v50 = vadd.f32 %v953_v48, %v952_v47  ;;  %v960_v51 = vrot.slane %v959_v49, 4  ;;  %v1209_v48 = vld [vmem:[#allocation5 + $0x540] sm:$0xff] }
 0x634   :  { %v955_v52 = vrot.slane %v954_v50, 2  ;;  %v961_v53 = vadd.f32 %v960_v51, %v959_v49  ;;  %v1210_v49 = vld [vmem:[#allocation5 + $0x548] sm:$0xff]  ;;  %v1211_v51 = vld [vmem:[#allocation5 + $0x550] sm:$0xff] }
 0x636   :  { %v956_v54 = vadd.f32 %v955_v52, %v954_v50  ;;  %v962_v55 = vrot.slane %v961_v53, 2  ;;  %v2493_v50 = vpack.c.bf16 %v1210_v49, %v1209_v48  ;;  %v1212_v52 = vld [vmem:[#allocation5 + $0x558] sm:$0xff]  ;;  %v1425_v49 = vld [vmem:[#allocation5 + $0x650] sm:$0xff] }
 0x638   :  { %v957_v56 = vrot.slane %v956_v54, 1  ;;  %v963_v57 = vadd.f32 %v962_v55, %v961_v53  ;;  %v1213_v53 = vld [vmem:[#allocation5 + $0x560] sm:$0xff]  ;;  %v1214_v55 = vld [vmem:[#allocation5 + $0x568] sm:$0xff] }
 0x63a   :  { %v958_v58 = vadd.f32 %v957_v56, %v956_v54  ;;  %v964_v59 = vrot.slane %v963_v57, 1  ;;  %v2496_v54 = vpack.c.bf16 %v1212_v52, %v1211_v51  ;;  %v2499_v56 = vpack.c.bf16 %v1214_v55, %v1213_v53  ;;  %v1427_v52 = vld [vmem:[#allocation5 + $0x660] sm:$0xff]  ;;  %v1428_v53 = vld [vmem:[#allocation5 + $0x668] sm:$0xff]  ;;  %v1429_v55 = vld [vmem:[#allocation5 + $0x670] sm:$0xff] }
 0x63c   :  { %v965_v60 = vadd.f32 %v964_v59, %v963_v57  ;;  %v966_v61 = vmul.f32 0.125, %v958_v58  ;;  %v1215_v57 = vld [vmem:[#allocation5 + $0x570] sm:$0xff]  ;;  %v1216_v58 = vld [vmem:[#allocation5 + $0x578] sm:$0xff] }
 0x63d   :  { %v2502_v59 = vpack.c.bf16 %v1216_v58, %v1215_v57 }
 0x63e   :  { %v967_v62 = vmul.f32 0.125, %v965_v60  ;;  %v968_v63 = vmul.f32 %v966_v61, %v966_v61  ;;  %v974_v7 = vsub.f32 %v952_v47, %v966_v61 }
 0x640   :  { %v969_v2 = vsub.f32 %v967_v62, %v968_v63  ;;  %v1535_v62 = vld [vmem:[#allocation7 + $0x6] ss:$0 sm:$0xff] }
 0x642   :  { %v971_v3 = vadd.f32 1e-05, %v969_v2 }
 0x644   :  { %2547 = vrsqrt.f32 %v971_v3 }
 0x64e   :  { %v2548_v5 = vpop.eup %2547 }
 0x64f   :  { %v973_v6 = vmul.f32 %v2548_v5, %v970_v4 }
 0x651   :  { %v978_v8 = vrot.slane %v973_v6, %v2745_v15 }
 0x653   :  { %v979_v12 = vmul.f32 %v978_v8, %v974_v7 }
 0x655   :  { %v985_v14 = vadd.f32 %v1534_v11, %v979_v12 }
 0x657   :  { %2074 = vmatmul.mubr.f32.vlgmr.msra.gmra.mrb[8].mxu0 %v985_v14  ;;  %2109 = vmatmul.mubr.f32.vlgmr.msra.gmra.mrb[8].mxu1 %v985_v14 }
 0x658   :  { %2458 = vmatpush3.bf16.msra.mxu0 %v2457_v13  ;;  %2143 = vmatprep.mubr.msk.f32.mxu0 %vm2653_vm0, %v2654_v1 }
 0x659   :  { %2459 = vmatprep.subr.bf16.mxu0 %v2652_v0  ;;  %2178 = vmatprep.mubr.msk.f32.mxu1 %vm2653_vm0, %v2654_v1 }
 0x65a   :  { %2482 = vmatpush3.bf16.msra.mxu1 %v2481_v40  ;;  %v1418_v40 = vld [vmem:[#allocation5 + $0x618] sm:$0xff] }
 0x65b   :  { %2483 = vmatprep.subr.bf16.mxu1 %v2652_v0  ;;  %v2508_v41 = vpack.c.bf16 %v1418_v40, %v1417_v39 }
 0x65c   :  { %2461 = vmatpush3.bf16.msra.mxu0 %v2460_v18 }
 0x65d   :  { %2462 = vmatprep.subr.bf16.mxu0 %v2652_v0 }
 0x65e   :  { %2485 = vmatpush3.bf16.msra.mxu1 %v2484_v43  ;;  %v1420_v43 = vld [vmem:[#allocation5 + $0x628] sm:$0xff] }
 0x65f   :  { %2486 = vmatprep.subr.bf16.mxu1 %v2652_v0  ;;  %v2511_v44 = vpack.c.bf16 %v1420_v43, %v1419_v42 }
 0x660   :  { %2464 = vmatpush3.bf16.msra.mxu0 %v2463_v21 }
 0x661   :  { %2465 = vmatprep.subr.bf16.mxu0 %v2652_v0 }
 0x662   :  { %2488 = vmatpush3.bf16.msra.mxu1 %v2487_v45  ;;  %v1422_v45 = vld [vmem:[#allocation5 + $0x638] sm:$0xff] }
 0x663   :  { %2489 = vmatprep.subr.bf16.mxu1 %v2652_v0 }
 0x664   :  { %2467 = vmatpush3.bf16.msra.mxu0 %v2466_v24 }
 0x665   :  { %2468 = vmatprep.subr.bf16.mxu0 %v2652_v0 }
 0x668   :  { %2470 = vmatpush3.bf16.msra.mxu0 %v2469_v28  ;;  %v1184_v28 = vld [vmem:[#allocation7 + $0xf] sm:$0x1] }
 0x669   :  { %2471 = vmatprep.subr.bf16.mxu0 %v2652_v0 }
 0x66c   :  { %2473 = vmatpush3.bf16.msra.mxu0 %v2472_v31 }
 0x66d   :  { %2474 = vmatprep.subr.bf16.mxu0 %v2652_v0 }
 0x670   :  { %2476 = vmatpush3.bf16.msra.mxu0 %v2475_v34 }
 0x671   :  { %2477 = vmatprep.subr.bf16.mxu0 %v2652_v0 }
 0x674   :  { %2479 = vmatpush3.bf16.msra.mxu0 %v2478_v37  ;;  %v1416_v37 = vld [vmem:[#allocation5 + $0x608] sm:$0xff] }
 0x675   :  { %2504 = vmatprep.subr.bf16.mxu0 %v2652_v0  ;;  %v2505_v38 = vpack.c.bf16 %v1416_v37, %v1415_v36 }
 0x677   :  { %2144 = vmatmul.mubr.f32.vlgmr.msra.gmra.mrb[10].mxu0 %v985_v14 }
 0x678   :  { %2213 = vmatprep.mubr.msk.f32.mxu0 %vm2653_vm0, %v2654_v1  ;;  %v1208_v1 = vld [vmem:[#allocation5 + $0x538] sm:$0xff]  ;;  %2506 = vmatpush3.bf16.msra.mxu0 %v2505_v38 }
 0x679   :  { %v2490_v47 = vpack.c.bf16 %v1208_v1, %v1207_v46  ;;  %2507 = vmatprep.subr.bf16.mxu0 %v2652_v0  ;;  %v2514_v46 = vpack.c.bf16 %v1422_v45, %v1421_v26  ;;  %v1423_v1 = vld [vmem:[#allocation5 + $0x640] sm:$0xff] }
 0x67b   :  { %2491 = vmatpush3.bf16.msra.mxu1 %v2490_v47  ;;  %v1424_v47 = vld [vmem:[#allocation5 + $0x648] sm:$0xff] }
 0x67c   :  { %2492 = vmatprep.subr.bf16.mxu1 %v2652_v0  ;;  %2509 = vmatpush3.bf16.msra.mxu0 %v2508_v41  ;;  %v2517_v48 = vpack.c.bf16 %v1424_v47, %v1423_v1 }
 0x67d   :  { %2510 = vmatprep.subr.bf16.mxu0 %v2652_v0 }
 0x67f   :  { %2494 = vmatpush3.bf16.msra.mxu1 %v2493_v50  ;;  %v1426_v50 = vld [vmem:[#allocation5 + $0x658] sm:$0xff] }
 0x680   :  { %2495 = vmatprep.subr.bf16.mxu1 %v2652_v0  ;;  %2512 = vmatpush3.bf16.msra.mxu0 %v2511_v44  ;;  %v2520_v51 = vpack.c.bf16 %v1426_v50, %v1425_v49 }
 0x681   :  { %2513 = vmatprep.subr.bf16.mxu0 %v2652_v0 }
 0x683   :  { %2497 = vmatpush3.bf16.msra.mxu1 %v2496_v54  ;;  %v2523_v54 = vpack.c.bf16 %v1428_v53, %v1427_v52 }
 0x684   :  { %2498 = vmatprep.subr.bf16.mxu1 %v2652_v0  ;;  %2515 = vmatpush3.bf16.msra.mxu0 %v2514_v46 }
 0x685   :  { %2516 = vmatprep.subr.bf16.mxu0 %v2652_v0 }
 0x687   :  { %2500 = vmatpush3.bf16.msra.mxu1 %v2499_v56  ;;  %v1430_v56 = vld [vmem:[#allocation5 + $0x678] sm:$0xff] }
 0x688   :  { %2501 = vmatprep.subr.bf16.mxu1 %v2652_v0  ;;  %2518 = vmatpush3.bf16.msra.mxu0 %v2517_v48  ;;  %v2526_v57 = vpack.c.bf16 %v1430_v56, %v1429_v55 }
 0x689   :  { %2519 = vmatprep.subr.bf16.mxu0 %v2652_v0 }
 0x68b   :  { %2503 = vmatpush3.bf16.msra.mxu1 %v2502_v59  ;;  %v1537_v59 = vld [vmem:[#allocation7 + $0x7] ss:$0 sm:$0xff] }
 0x68c   :  { %2521 = vmatpush3.bf16.msra.mxu0 %v2520_v51 }
 0x68d   :  { %2522 = vmatprep.subr.bf16.mxu0 %v2652_v0 }
 0x690   :  { %2524 = vmatpush3.bf16.msra.mxu0 %v2523_v54 }
 0x691   :  { %2525 = vmatprep.subr.bf16.mxu0 %v2652_v0 }
 0x694   :  { %2527 = vmatpush3.bf16.msra.mxu0 %v2526_v57 }
 0x72a   :  { %v1086_v60 = vpop.f32.mrb[8].mxu0  ;;  %v1156_v61 = vpop.f32.mrb[8].mxu1 }
 0x72b   :  { %v1157_v63 = vadd.f32 %v1156_v61, %v1086_v60  ;;  %v2075_v2 = vpop.f32.mrb[9].mxu0  ;;  %v2110_v3 = vpop.f32.mrb[9].mxu1 }
 0x72d   :  { %v1165_v4 = vadd.f32 %v1535_v62, %v1157_v63 }
 0x72f   :  { %v1166_v5 = vmax.f32 %v1165_v4, 0.0 }
 0x731   :  { %v1167_v6 = vrot.slane %v1166_v5, 4  ;;  %v1173_v7 = vmul.f32 %v1166_v5, %v1166_v5 }
 0x733   :  { %v1168_v8 = vadd.f32 %v1167_v6, %v1166_v5  ;;  %v1174_v9 = vrot.slane %v1173_v7, 4 }
 0x735   :  { %v1169_v10 = vrot.slane %v1168_v8, 2  ;;  %v1175_v11 = vadd.f32 %v1174_v9, %v1173_v7 }
 0x737   :  { %v1170_v12 = vadd.f32 %v1169_v10, %v1168_v8  ;;  %v1176_v13 = vrot.slane %v1175_v11, 2 }
 0x739   :  { %v1171_v14 = vrot.slane %v1170_v12, 1  ;;  %v1177_v16 = vadd.f32 %v1176_v13, %v1175_v11 }
 0x73b   :  { %v1172_v17 = vadd.f32 %v1171_v14, %v1170_v12  ;;  %v1178_v18 = vrot.slane %v1177_v16, 1 }
 0x73d   :  { %v1179_v19 = vadd.f32 %v1178_v18, %v1177_v16  ;;  %v1180_v20 = vmul.f32 0.125, %v1172_v17 }
 0x73f   :  { %v1181_v21 = vmul.f32 0.125, %v1179_v19  ;;  %v1182_v22 = vmul.f32 %v1180_v20, %v1180_v20  ;;  %v1188_v31 = vsub.f32 %v1166_v5, %v1180_v20  ;;  %v1398_v20 = vld [vmem:[#allocation7 + $0x10] sm:$0x1] }
 0x741   :  { %v1183_v23 = vsub.f32 %v1181_v21, %v1182_v22 }
 0x743   :  { %v1185_v24 = vadd.f32 1e-05, %v1183_v23 }
 0x745   :  { %2549 = vrsqrt.f32 %v1185_v24 }
 0x74a   :  { %v1300_v25 = vpop.f32.mrb[10].mxu0 }
 0x74b   :  { %v2145_v27 = vpop.f32.mrb[11].mxu0 }
 0x74f   :  { %v2550_v29 = vpop.eup %2549 }
 0x750   :  { %v1187_v30 = vmul.f32 %v2550_v29, %v1184_v28  ;;  %v1539_v29 = vld [vmem:[#allocation7 + $0x8] ss:$0 sm:$0xff] }
 0x752   :  { %v1192_v32 = vrot.slane %v1187_v30, %v2745_v15 }
 0x754   :  { %v1193_v34 = vmul.f32 %v1192_v32, %v1188_v31 }
 0x756   :  { %v1199_v35 = vadd.f32 %v1536_v33, %v1193_v34 }
 0x758   :  { %2179 = vmatmul.mubr.f32.vlgmr.msra.gmra.mrb[10].mxu1 %v1199_v35 }
 0x82b   :  { %v1370_v58 = vpop.f32.mrb[10].mxu1 }
 0x82c   :  { %v1371_v60 = vadd.f32 %v1370_v58, %v1300_v25  ;;  %v2180_v61 = vpop.f32.mrb[11].mxu1  ;;  %v1538_v25 = vld [vmem:[#allocation7 + $0x18] ss:$0 sm:$0xff] }
 0x82e   :  { %v1379_v62 = vadd.f32 %v1537_v59, %v1371_v60 }
 0x830   :  { %v1380_v63 = vmax.f32 %v1379_v62, 0.0 }
 0x832   :  { %v1381_v2 = vrot.slane %v1380_v63, 4  ;;  %v1387_v3 = vmul.f32 %v1380_v63, %v1380_v63 }
 0x834   :  { %v1382_v4 = vadd.f32 %v1381_v2, %v1380_v63  ;;  %v1388_v5 = vrot.slane %v1387_v3, 4 }
 0x836   :  { %v1383_v6 = vrot.slane %v1382_v4, 2  ;;  %v1389_v7 = vadd.f32 %v1388_v5, %v1387_v3 }
 0x838   :  { %v1384_v8 = vadd.f32 %v1383_v6, %v1382_v4  ;;  %v1390_v9 = vrot.slane %v1389_v7, 2 }
 0x83a   :  { %v1385_v10 = vrot.slane %v1384_v8, 1  ;;  %v1391_v11 = vadd.f32 %v1390_v9, %v1389_v7 }
 0x83c   :  { %v1386_v12 = vadd.f32 %v1385_v10, %v1384_v8  ;;  %v1392_v13 = vrot.slane %v1391_v11, 1 }
 0x83e   :  { %v1393_v0 = vadd.f32 %v1392_v13, %v1391_v11  ;;  %v1394_v14 = vmul.f32 0.125, %v1386_v12 }
 0x840   :  { %v1395_v16 = vmul.f32 0.125, %v1393_v0  ;;  %v1396_v17 = vmul.f32 %v1394_v14, %v1394_v14  ;;  %v1402_v23 = vsub.f32 %v1380_v63, %v1394_v14 }
 0x842   :  { %v1397_v18 = vsub.f32 %v1395_v16, %v1396_v17 }
 0x844   :  { %v1399_v19 = vadd.f32 1e-05, %v1397_v18 }
 0x846   :  { %2551 = vrsqrt.f32 %v1399_v19 }
 0x850   :  { %v2552_v21 = vpop.eup %2551 }
 0x851   :  { %v1401_v22 = vmul.f32 %v2552_v21, %v1398_v20 }
 0x853   :  { %v1406_v24 = vrot.slane %v1401_v22, %v2745_v15 }
 0x855   :  { %v1407_v27 = vmul.f32 %v1406_v24, %v1402_v23 }
 0x857   :  { %v1413_v28 = vadd.f32 %v1538_v25, %v1407_v27 }
 0x859   :  { %2214 = vmatmul.mubr.f32.vlgmr.msra.gmra.mrb[12].mxu0 %v1413_v28 }
 0x92c   :  { %v1502_v30 = vpop.f32.mrb[12].mxu0 }
 0x92d   :  { %v1503_v31 = vadd.f32 %v1539_v29, %v1502_v30  ;;  %v2215_v32 = vpop.f32.mrb[13].mxu0 }
 0x92f   :  { %1506 = vst [vmem:[#allocation8] sm:$0xff] %v1503_v31 }
 0x930   :  { %2630 = shalt.err (!%p2627_p0)
}
 0x931   :  { %s2631_s25 = scalar_lea.hbm %s2878_s3, 128 }
 0x932   :  { %p2632_p1 = scmp.ne.s32.totalorder %s2878_s3, %s2631_s25  ;;  %p2635_p2 = scmp.lt.u32.totalorder %s2631_s25, %s2878_s3 }
 0x934   :  { %p2637_p3 = pnand %p2635_p2, %p2632_p1 }
 0x936   :  { %2640 = shalt.err (!%p2637_p3)
}
 0x937   :  { %1516 = dma.vmem_to_hbm [thread:$0]  %s1514_s21, 128, %s2878_s3, [#allocation4]  }
 0x938   :  { %2645 = dma.done.wait [#allocation4], 128  }
 0x939   :  { %2646 = vsyncadd [#allocation4], 4294967168 }
 0x93a   :  { %1520 = vsyncpa [#allocation3], 1 }
 0x93b   :  { %1521 = vsyncpa [#allocation6], 1 }
 0x93c   :  { %1522 = vsyncpa [#allocation4], 1 }

</bundles_post_ra>
